<compile_context>
chip_gen: v6e
topology: v6e:2x2x1
jax: 0.10.0
libtpu: 0.0.40
codegen_flags: <defaults>
</compile_context>

<pallas_src>
import math

import jax
import jax.numpy as jnp
from jax.experimental import pallas as pl
from jax.experimental.pallas import tpu as pltpu

NEG_SLOPE = 0.01  # F.leaky_relu default negative_slope


def _round_up(x, m):
    return ((x + m - 1) // m) * m


def _pick_tile_m(n_pad, d_pad, budget_bytes=20 * 1024 * 1024):
    """Pick a dst-row tile that fits comfortably in VMEM on v5e/v6e/v7x."""
    # resident: z (bf16, full) + M + a_src ; per-step (double-buffered): adj/e0/e1
    # f32 [tm, n_pad] planes + a_dst + out block.
    resident = n_pad * d_pad * 2 + 2 * d_pad * 4 + n_pad * 4
    for tm in (512, 256, 128):
        if tm > n_pad:
            continue
        per_step = 2 * (3 * tm * n_pad * 4 + tm * 4 + tm * d_pad * 4)
        if resident + per_step <= budget_bytes:
            return tm
    # TODO(synk): for very large N where even TM=128 full-width rows overflow VMEM,
    # add a second ("arbitrary") src-tile grid axis with flash-style online softmax.
    return 128


def agat_kernel(vscal_ref,                       # SMEM (2,)  v = We^T @ wa_e
                adj_ref, e0_ref, e1_ref,         # [TM, N]    dst-row tiles
                a_dst_ref, a_src_ref,            # [TM, 1], [1, N]
                z_ref,                           # [N, D]  bf16, full/resident
                m_ref,                           # [2, D]  M = We^T @ Wez^T
                out_ref):                        # [TM, D]
    v0 = vscal_ref[0]
    v1 = vscal_ref[1]

    adj = adj_ref[...]
    edge_mask = adj > 0.0
    e0 = e0_ref[...]
    e1 = e1_ref[...]

    # attention logits: leaky_relu(z_src·wa_src + z_dst·wa_dst + e·v)   (f32, VPU)
    logits = a_dst_ref[...] + a_src_ref[...] + (e0 * v0 + e1 * v1)      # [TM, N]
    logits = jnp.where(logits >= 0, logits, NEG_SLOPE * logits)

    # masked softmax over incoming (src) edges -- keep everything f32.
    masked = jnp.where(edge_mask, logits, jnp.float32(-1e30))
    mrow = jnp.max(masked, axis=1, keepdims=True)
    p = jnp.where(edge_mask, jnp.exp(masked - mrow), 0.0)
    denom = jnp.sum(p, axis=1, keepdims=True)
    # guard zero-in-degree / padded rows (denom==0 -> attn==0, not NaN); EUP reciprocal.
    inv = pl.reciprocal(jnp.maximum(denom, jnp.float32(1e-30)), approx=True)
    attn = p * inv                                                       # [TM, N] f32

    # node messages: MXU matmul in bf16 with f32 accumulation.
    h_node = jnp.dot(attn.astype(jnp.bfloat16), z_ref[...],
                     preferred_element_type=jnp.float32)                 # [TM, D]

    # edge messages, re-associated: never build a [TM, N, D] tensor.
    s0 = jnp.sum(attn * e0, axis=1, keepdims=True)                       # [TM, 1]
    s1 = jnp.sum(attn * e1, axis=1, keepdims=True)                       # [TM, 1]
    h_edge = s0 * m_ref[0:1, :] + s1 * m_ref[1:2, :]                     # [TM, D] VPU

    out_ref[...] = (h_node + h_edge).astype(out_ref.dtype)


def agat_forward(h, e, adj, params, *, tile_m=None, interpret=False):
    """Dense-graph AGATLayer forward. h:[N,Din], e:[N,N,2], adj:[N,N] (dst, src)."""
    N, _ = h.shape
    dout = params["fc_w"].shape[0]

    # ---- tiny per-node / 2-dim edge linears: fold into vectors fed to the kernel ----
    z = h @ params["fc_w"].T                                   # [N, dout] f32
    wa = params["attn_w"][0]                                   # [2*dout + 2]
    a_src = (z @ wa[:dout])[None, :]                           # [1, N]  (src term)
    a_dst = (z @ wa[dout:2 * dout])[:, None]                   # [N, 1]  (dst term)
    wa_e = wa[2 * dout:]                                       # [2]
    v = params["edge_w"].T @ wa_e                              # [2]      eatt = e @ v
    m_small = params["edge_w"].T @ params["e2n_w"].T           # [2, dout] edge->node mix

    # ---- padding to lane-dense, MXU-friendly shapes ----
    d_pad = _round_up(max(dout, 128), 128)
    if tile_m is None:
        tile_m = _pick_tile_m(_round_up(N, 128), d_pad)
    n_pad = _round_up(N, tile_m)
    pn, pd = n_pad - N, d_pad - dout

    adj_p = jnp.pad(adj.astype(jnp.float32), ((0, pn), (0, pn)))
    e0_p = jnp.pad(e[..., 0].astype(jnp.float32), ((0, pn), (0, pn)))
    e1_p = jnp.pad(e[..., 1].astype(jnp.float32), ((0, pn), (0, pn)))
    a_dst_p = jnp.pad(a_dst.astype(jnp.float32), ((0, pn), (0, 0)))
    a_src_p = jnp.pad(a_src.astype(jnp.float32), ((0, 0), (0, pn)))
    z_p = jnp.pad(z, ((0, pn), (0, pd))).astype(jnp.bfloat16)
    m_p = jnp.pad(m_small, ((0, 0), (0, pd))).astype(jnp.float32)
    vscal = v.astype(jnp.float32)

    grid = (n_pad // tile_m,)
    out = pl.pallas_call(
        agat_kernel,
        out_shape=jax.ShapeDtypeStruct((n_pad, d_pad), jnp.float32),
        grid=grid,
        in_specs=[
            pl.BlockSpec(memory_space=pltpu.MemorySpace.SMEM),      # v (2 scalars)
            pl.BlockSpec((tile_m, n_pad), lambda i: (i, 0)),        # adj rows
            pl.BlockSpec((tile_m, n_pad), lambda i: (i, 0)),        # e plane 0
            pl.BlockSpec((tile_m, n_pad), lambda i: (i, 0)),        # e plane 1
            pl.BlockSpec((tile_m, 1), lambda i: (i, 0)),            # a_dst rows
            pl.BlockSpec((1, n_pad), lambda i: (0, 0)),             # a_src (full)
            pl.BlockSpec((n_pad, d_pad), lambda i: (0, 0)),         # z (full, bf16)
            pl.BlockSpec((2, d_pad), lambda i: (0, 0)),             # M
        ],
        out_specs=pl.BlockSpec((tile_m, d_pad), lambda i: (i, 0)),
        compiler_params=pltpu.CompilerParams(
            dimension_semantics=("parallel",)),
        interpret=interpret,
    )(vscal, adj_p, e0_p, e1_p, a_dst_p, a_src_p, z_p, m_p)
    return out[:N, :dout]


def agat_reference(h, e, adj, params):
    """Pure-JAX (f32) reference of the same dense-graph semantics."""
    z = h @ params["fc_w"].T
    dout = z.shape[1]
    ex = jnp.einsum("ije,fe->ijf", e, params["edge_w"])
    wa = params["attn_w"][0]
    logits = ((z @ wa[dout:2 * dout])[:, None]
              + (z @ wa[:dout])[None, :]
              + jnp.einsum("ije,e->ij", ex, wa[2 * dout:]))
    logits = jnp.where(logits >= 0, logits, NEG_SLOPE * logits)
    masked = jnp.where(adj > 0, logits, -1e30)
    attn = jax.nn.softmax(masked, axis=1)
    attn = jnp.where(adj > 0, attn, 0.0)
    ez = jnp.einsum("ije,fe->ijf", ex, params["e2n_w"])
    return attn @ z + jnp.sum(attn[:, :, None] * ez, axis=1)


def xavier_normal(key, out_dim, in_dim, gain):
    std = gain * math.sqrt(2.0 / (in_dim + out_dim))
    return std * jax.random.normal(key, (out_dim, in_dim), dtype=jnp.float32)


if __name__ == "__main__":
    key = jax.random.PRNGKey(0)
    N, din, dout, edge_dim = 200, 48, 64, 2
    ks = jax.random.split(key, 7)
    gain = math.sqrt(2.0)  # nn.init.calculate_gain('relu')

    params = {
        "fc_w":   xavier_normal(ks[0], dout, din, gain),               # fc.weight
        "attn_w": xavier_normal(ks[1], 1, 2 * dout + edge_dim, gain),  # attn_fc.weight
        "edge_w": xavier_normal(ks[2], edge_dim, edge_dim, gain),      # fc_edge_for_att_calc
        "e2n_w":  xavier_normal(ks[3], dout, edge_dim, gain),          # fc_eFeatsDim_to_nFeatsDim
    }

    h = jax.random.normal(ks[4], (N, din), dtype=jnp.float32)
    e_dense = jax.random.normal(ks[5], (N, N, edge_dim), dtype=jnp.float32)
    # random adjacency (dst, src); self-loops guarantee >=1 incoming edge
    # (DGL's softmax is over existing in-edges only), padded rows exercise the guard.
    adj = (jax.random.uniform(ks[6], (N, N)) < 0.3).astype(jnp.float32)
    adj = jnp.maximum(adj, jnp.eye(N, dtype=jnp.float32))

    fwd = jax.jit(agat_forward, static_argnames=("tile_m", "interpret"))
    out = fwd(h, e_dense, adj, params, tile_m=128)   # grid=(2,) at these shapes
    out = jax.block_until_ready(out)

    ref = agat_reference(h, e_dense, adj, params)
    assert out.shape == (N, dout)
    assert bool(jnp.all(jnp.isfinite(out)))
    # attn@z runs in bf16 on the MXU (f32 accumulation) -> relaxed tolerance vs f32 ref.
    assert bool(jnp.allclose(out, ref, rtol=2e-2, atol=2e-2)), "mismatch vs reference"
    print("KERNEL_OK")
</pallas_src>

<mosaic_0001>
module attributes {stable_mosaic.version = 11 : i64} {
  func.func @agat_kernel(%arg0: i32, %arg1: memref<2xf32, #tpu.memory_space<smem>>, %arg2: memref<128x256xf32, #tpu.memory_space<vmem>>, %arg3: memref<128x256xf32, #tpu.memory_space<vmem>>, %arg4: memref<128x256xf32, #tpu.memory_space<vmem>>, %arg5: memref<128x1xf32, #tpu.memory_space<vmem>>, %arg6: memref<1x256xf32, #tpu.memory_space<vmem>>, %arg7: memref<256x128xbf16, #tpu.memory_space<vmem>>, %arg8: memref<2x128xf32, #tpu.memory_space<vmem>>, %arg9: memref<128x128xf32, #tpu.memory_space<vmem>>) attributes {dimension_semantics = [#tpu.dimension_semantics<parallel>], iteration_bounds = array<i64: 2>, scalar_prefetch = 0 : i64, scratch_operands = 0 : i64, tpu.core_type = #tpu.core_type<tc>, window_params = [{transform_indices = @transform_0, window_bounds = array<i64: 2>}, {transform_indices = @transform_1, window_bounds = array<i64: 128, 256>}, {transform_indices = @transform_2, window_bounds = array<i64: 128, 256>}, {transform_indices = @transform_3, window_bounds = array<i64: 128, 256>}, {transform_indices = @transform_4, window_bounds = array<i64: 128, 1>}, {pipeline_mode = #tpu.pipeline_mode<synchronous>, transform_indices = @transform_5, window_bounds = array<i64: 1, 256>}, {pipeline_mode = #tpu.pipeline_mode<synchronous>, transform_indices = @transform_6, window_bounds = array<i64: 256, 128>}, {pipeline_mode = #tpu.pipeline_mode<synchronous>, transform_indices = @transform_7, window_bounds = array<i64: 2, 128>}, {transform_indices = @transform_8, window_bounds = array<i64: 128, 128>}]} {
    %c0 = arith.constant 0 : index
    %0 = memref.load %arg1[%c0] : memref<2xf32, #tpu.memory_space<smem>>
    %c1 = arith.constant 1 : index
    %1 = memref.load %arg1[%c1] : memref<2xf32, #tpu.memory_space<smem>>
    %c0_0 = arith.constant 0 : index
    %c0_1 = arith.constant 0 : index
    %2 = vector.load %arg2[%c0_0, %c0_1] : memref<128x256xf32, #tpu.memory_space<vmem>>, vector<128x256xf32>
    %cst = arith.constant 0.000000e+00 : f32
    %3 = vector.broadcast %cst : f32 to vector<128x256xf32>
    %4 = arith.cmpf ogt, %2, %3 : vector<128x256xf32>
    %c0_2 = arith.constant 0 : index
    %c0_3 = arith.constant 0 : index
    %5 = vector.load %arg3[%c0_2, %c0_3] : memref<128x256xf32, #tpu.memory_space<vmem>>, vector<128x256xf32>
    %c0_4 = arith.constant 0 : index
    %c0_5 = arith.constant 0 : index
    %6 = vector.load %arg4[%c0_4, %c0_5] : memref<128x256xf32, #tpu.memory_space<vmem>>, vector<128x256xf32>
    %c0_6 = arith.constant 0 : index
    %c0_7 = arith.constant 0 : index
    %7 = vector.load %arg5[%c0_6, %c0_7] : memref<128x1xf32, #tpu.memory_space<vmem>>, vector<128x1xf32>
    %c0_8 = arith.constant 0 : index
    %c0_9 = arith.constant 0 : index
    %8 = vector.load %arg6[%c0_8, %c0_9] : memref<1x256xf32, #tpu.memory_space<vmem>>, vector<1x256xf32>
    %9 = vector.broadcast %7 : vector<128x1xf32> to vector<128x256xf32>
    %10 = vector.broadcast %8 : vector<1x256xf32> to vector<128x256xf32>
    %11 = arith.addf %9, %10 : vector<128x256xf32>
    %12 = vector.broadcast %0 : f32 to vector<128x256xf32>
    %13 = arith.mulf %5, %12 : vector<128x256xf32>
    %14 = vector.broadcast %1 : f32 to vector<128x256xf32>
    %15 = arith.mulf %6, %14 : vector<128x256xf32>
    %16 = arith.addf %13, %15 : vector<128x256xf32>
    %17 = arith.addf %11, %16 : vector<128x256xf32>
    %cst_10 = arith.constant 0.000000e+00 : f32
    %18 = vector.broadcast %cst_10 : f32 to vector<128x256xf32>
    %19 = arith.cmpf oge, %17, %18 : vector<128x256xf32>
    %cst_11 = arith.constant 0.00999999977 : f32
    %20 = vector.broadcast %cst_11 : f32 to vector<128x256xf32>
    %21 = arith.mulf %20, %17 : vector<128x256xf32>
    %22 = arith.select %19, %17, %21 : vector<128x256xi1>, vector<128x256xf32>
    %cst_12 = arith.constant -1.000000e+30 : f32
    %23 = vector.broadcast %cst_12 : f32 to vector<128x256xf32>
    %24 = arith.select %4, %22, %23 : vector<128x256xi1>, vector<128x256xf32>
    %cst_13 = arith.constant dense<0xFF800000> : vector<128xf32>
    %25 = vector.multi_reduction <maximumf>, %24, %cst_13 [1] : vector<128x256xf32> to vector<128xf32>
    %26 = vector.shape_cast %25 : vector<128xf32> to vector<128x1xf32>
    %27 = vector.broadcast %26 : vector<128x1xf32> to vector<128x256xf32>
    %28 = arith.subf %24, %27 : vector<128x256xf32>
    %29 = math.exp %28 : vector<128x256xf32>
    %cst_14 = arith.constant 0.000000e+00 : f32
    %30 = vector.broadcast %cst_14 : f32 to vector<128x256xf32>
    %31 = arith.select %4, %29, %30 : vector<128x256xi1>, vector<128x256xf32>
    %cst_15 = arith.constant dense<0.000000e+00> : vector<128xf32>
    %32 = vector.multi_reduction <add>, %31, %cst_15 [1] : vector<128x256xf32> to vector<128xf32>
    %33 = vector.shape_cast %32 : vector<128xf32> to vector<128x1xf32>
    %cst_16 = arith.constant 1.000000e-30 : f32
    %34 = vector.broadcast %cst_16 : f32 to vector<128x1xf32>
    %35 = arith.maximumf %33, %34 : vector<128x1xf32>
    %36 = tpu.reciprocal %35 {approx = true} : vector<128x1xf32> -> vector<128x1xf32>
    %37 = vector.broadcast %36 : vector<128x1xf32> to vector<128x256xf32>
    %38 = arith.mulf %31, %37 : vector<128x256xf32>
    %39 = arith.truncf %38 : vector<128x256xf32> to vector<128x256xbf16>
    %c0_17 = arith.constant 0 : index
    %c0_18 = arith.constant 0 : index
    %40 = vector.load %arg7[%c0_17, %c0_18] : memref<256x128xbf16, #tpu.memory_space<vmem>>, vector<256x128xbf16>
    %cst_19 = arith.constant dense<0.000000e+00> : vector<128x128xf32>
    %41 = tpu.matmul %39, %40, %cst_19 {dimension_numbers = #tpu.dot_dimension_numbers<[1], [0], [0], [1], [0, 0, 1, 1], [], []>} : vector<128x256xbf16>, vector<256x128xbf16>, vector<128x128xf32> -> vector<128x128xf32>
    %42 = arith.mulf %38, %5 : vector<128x256xf32>
    %cst_20 = arith.constant dense<0.000000e+00> : vector<128xf32>
    %43 = vector.multi_reduction <add>, %42, %cst_20 [1] : vector<128x256xf32> to vector<128xf32>
    %44 = vector.shape_cast %43 : vector<128xf32> to vector<128x1xf32>
    %45 = arith.mulf %38, %6 : vector<128x256xf32>
    %cst_21 = arith.constant dense<0.000000e+00> : vector<128xf32>
    %46 = vector.multi_reduction <add>, %45, %cst_21 [1] : vector<128x256xf32> to vector<128xf32>
    %47 = vector.shape_cast %46 : vector<128xf32> to vector<128x1xf32>
    %c0_22 = arith.constant 0 : index
    %c0_23 = arith.constant 0 : index
    %48 = vector.load %arg8[%c0_22, %c0_23] : memref<2x128xf32, #tpu.memory_space<vmem>>, vector<1x128xf32>
    %49 = vector.broadcast %44 : vector<128x1xf32> to vector<128x128xf32>
    %50 = vector.broadcast %48 : vector<1x128xf32> to vector<128x128xf32>
    %51 = arith.mulf %49, %50 : vector<128x128xf32>
    %c1_24 = arith.constant 1 : index
    %c0_25 = arith.constant 0 : index
    %52 = vector.load %arg8[%c1_24, %c0_25] : memref<2x128xf32, #tpu.memory_space<vmem>>, vector<1x128xf32>
    %53 = vector.broadcast %47 : vector<128x1xf32> to vector<128x128xf32>
    %54 = vector.broadcast %52 : vector<1x128xf32> to vector<128x128xf32>
    %55 = arith.mulf %53, %54 : vector<128x128xf32>
    %56 = arith.addf %51, %55 : vector<128x128xf32>
    %57 = arith.addf %41, %56 : vector<128x128xf32>
    %c0_26 = arith.constant 0 : index
    %c0_27 = arith.constant 0 : index
    %58 = vector.load %arg9[%c0_26, %c0_27] : memref<128x128xf32, #tpu.memory_space<vmem>>, vector<128x128xf32>
    tpu.vector_store %arg9[%c0_26, %c0_27], %57 {strides = array<i32>} : memref<128x128xf32, #tpu.memory_space<vmem>>, vector<128x128xf32>,
    return
  }
  func.func @transform_0(%arg0: i32) -> i32 {
    %c0_i32 = arith.constant 0 : i32
    %c0_i32_0 = arith.constant 0 : i32
    return %c0_i32 : i32
  }
  func.func @transform_1(%arg0: i32) -> (i32, i32) {
    %c0_i32 = arith.constant 0 : i32
    %c0_i32_0 = arith.constant 0 : i32
    return %arg0, %c0_i32 : i32, i32
  }
  func.func @transform_2(%arg0: i32) -> (i32, i32) {
    %c0_i32 = arith.constant 0 : i32
    %c0_i32_0 = arith.constant 0 : i32
    return %arg0, %c0_i32 : i32, i32
  }
  func.func @transform_3(%arg0: i32) -> (i32, i32) {
    %c0_i32 = arith.constant 0 : i32
    %c0_i32_0 = arith.constant 0 : i32
    return %arg0, %c0_i32 : i32, i32
  }
  func.func @transform_4(%arg0: i32) -> (i32, i32) {
    %c0_i32 = arith.constant 0 : i32
    %c0_i32_0 = arith.constant 0 : i32
    return %arg0, %c0_i32 : i32, i32
  }
  func.func @transform_5(%arg0: i32) -> (i32, i32) {
    %c0_i32 = arith.constant 0 : i32
    %c0_i32_0 = arith.constant 0 : i32
    %c0_i32_1 = arith.constant 0 : i32
    return %c0_i32, %c0_i32_0 : i32, i32
  }
  func.func @transform_6(%arg0: i32) -> (i32, i32) {
    %c0_i32 = arith.constant 0 : i32
    %c0_i32_0 = arith.constant 0 : i32
    %c0_i32_1 = arith.constant 0 : i32
    return %c0_i32, %c0_i32_0 : i32, i32
  }
  func.func @transform_7(%arg0: i32) -> (i32, i32) {
    %c0_i32 = arith.constant 0 : i32
    %c0_i32_0 = arith.constant 0 : i32
    %c0_i32_1 = arith.constant 0 : i32
    return %c0_i32, %c0_i32_0 : i32, i32
  }
  func.func @transform_8(%arg0: i32) -> (i32, i32) {
    %c0_i32 = arith.constant 0 : i32
    %c0_i32_0 = arith.constant 0 : i32
    return %arg0, %c0_i32 : i32, i32
  }
}

</mosaic_0001>

<bundles_post_ra>
// kernel: agat_forward.1
= control target key start
LH: loop header
LB: loop body
LE: loop exit
PB: predicated region body
PF: predicated region fallthrough
CT: control target
= control target key end

     0   :  { %13 = vsyncpa [#allocation3], 0  ;;  %s2190_s27 = smov 0   ;;  %s3547_s0 = inlined_call_operand.vmem [shape: f32[2], index: 0, kind: input, shape index: {}]   ;;  %s3548_s1 = inlined_call_operand.vmem [shape: f32[256,256], index: 1, kind: input, shape index: {}]   ;;  %s3549_s2 = inlined_call_operand.vmem [shape: f32[256,256], index: 2, kind: input, shape index: {}]   ;;  %s3550_s3 = inlined_call_operand.vmem [shape: f32[256,256], index: 3, kind: input, shape index: {}]   ;;  %s3551_s4 = inlined_call_operand.vmem [shape: f32[256,1], index: 4, kind: input, shape index: {}]   ;;  %s3552_s5 = inlined_call_operand.vmem [shape: f32[1,256], index: 5, kind: input, shape index: {}]   ;;  %s3553_s6 = inlined_call_operand.vmem [shape: bf16[256,128], index: 6, kind: input, shape index: {}]   ;;  %s3554_s7 = inlined_call_operand.vmem [shape: f32[2,128], index: 7, kind: input, shape index: {}]   ;;  %s3555_s8 = inlined_call_operand.vmem [shape: f32[256,128], index: 8, kind: output, shape index: {}]  }
   0x1 LB: > { %s1794_s28 = sadd.s32 4294967295, %s2141_s27   ;;  %p1796_p0 = scmp.ge.s32.totalorder %s2141_s27, 1  ;;  %s2141_s27 = sphi %s2190_s27, %s19_s27  }
   0x2   : > { %p238_p1 = scmp.lt.s32.totalorder %s2141_s27, 3  ;;  %s251_s9 = sshll.u32 %s3547_s0, 4  ;;  %s252_s9 = int_to_ptr.vmem [resolvable:$true] %s251_s9 }
   0x3   : > { %p2205_p3 = scmp.eq.s32.totalorder %s1794_s28, 0  ;;  %s2116_s12 = scalar_lea.vmem %s252_s9, 16 }
   0x4   : > { %p2201_p2 = pnand %p1796_p0, %p238_p1  ;;  %p2117_p6 = scmp.ne.s32.totalorder %s252_s9, %s2116_s12 }
   0x5   : > { %p2124_p10 = scmp.lt.s32.totalorder %s252_s9, %s252_s9  ;;  %p2125_p11 = scmp.lt.s32.totalorder %s2116_s12, %s2116_s12 }
   0x6   : > { %p1922_p4 = pneg %p2201_p2 }
   0x7   : > { %p2126_p12 = por %p2125_p11, %p2124_p10 }
   0x8   : > { %p1923_p5 = pnand %p2205_p3, %p1922_p4 }
   0xa   : > { %p2118_p7 = pneg %p1923_p5 }
   0xc   : > { %p2119_p8 = pnand %p2118_p7, %p2117_p6 }
   0xe   : > { %p2120_p9 = pneg %p2119_p8 }
  0x10   : > { %p2127_p13 = pnand %p2126_p12, %p2120_p9 }
  0x12   : > { %2130 = shalt.err (!%p2127_p13)
}
  0x13   : > { %s2143_s13 = smov [#allocation2]   ;;  %312 = sbr.rel (%p2201_p2) target bundleno = 747 (0x2eb), region = 52 }
  0x14   : > { %1925 = dma.vmem_to_smem (!%p1923_p5), %s252_s9, 16, %s2143_s13, [#allocation3]  }
  0x18   : > { %2136 = dma.done.wait (%p2205_p3), [#allocation3], 16  }
  0x19   : > { %2138 = vsyncadd (%p2205_p3), [#allocation3], 4294967280 }
  0x1a   : > { %318 = sfence }
  0x1b   : > { %s1801_s14 = sshll.u32 %s1794_s28, 4  ;;  %v2144_v0 = vmov 0   ;;  %s399_s19 = sld [smem:[#allocation2]]  ;;  %v627_v17 = vlaneseq  ;;  %v545_v43 = vld [vmem:[%s3552_s5] sm:$0x3] }
  0x1c   : > { %1939 = vset.pattern.permute.xlu1 %v2144_v0  ;;  %1938 = vset.pattern.permute.xlu0 %v2144_v0  ;;  %p366_p0 = scmp.lt.s32.totalorder %s1801_s14, 31  ;;  %s1814_s20 = sld [smem:[#allocation2 + $0x1]] }
  0x1d   : > { %v628_v18 = vshrl.u32 %v627_v17, 7 }
  0x1e   : > { %s3645_s14 = smov (!%p366_p0, %s1801_s14), 31 }
  0x1f   : > { %s1811_s15 = sshll.u32 %s3645_s14, 3  ;;  %s2228_s21 = sshll.u32 %s3645_s14, 4  ;;  %v629_v31 = vsub.s32 0, %v628_v18  ;;  %v633_v32 = vsub.s32 1, %v628_v18 }
  0x20   : > { %s390_s18 = scalar_lea.vmem %s3551_s4, %s1811_s15  ;;  %s2234_s24 = scalar_lea.vmem %s3549_s2, %s2228_s21 }
  0x21   : > { %v537_v1 = vld [vmem:[%s390_s18 + $0x40] sm:$0xff]  ;;  %v538_v3 = vld [vmem:[%s390_s18 + $0x48] sm:$0xff]  ;;  %v532_v5 = vld [vmem:[%s390_s18 + $0x18] sm:$0xff]  ;;  %s2240_s28 = scalar_lea.vmem %s3550_s3, %s2228_s21  ;;  %v2246_v23 = vstv %s399_s19  ;;  %v2289_v0 = vrot.slane %v545_v43, %v629_v31  ;;  %s2361_s11 = scalar_lea.vmem %s3548_s1, %s2228_s21 }
  0x22   : > { %v529_v2 = vld [vmem:[%s390_s18] sm:$0xff]  ;;  %588 = vperm.xlu1 %1939, %v537_v1   ;;  %v530_v4 = vld [vmem:[%s390_s18 + $0x8] sm:$0xff]  ;;  %v531_v6 = vld [vmem:[%s390_s18 + $0x10] sm:$0xff]  ;;  %v2251_v27 = vstv %s1814_s20  ;;  %v2291_v1 = vrot.slane %v545_v43, %v633_v32  ;;  %s3480_s16 = scalar_lea.vmem %s3555_s8, %s1811_s15 }
  0x23   : > { %548 = vperm.xlu0 %1938, %v529_v2   ;;  %v540_v7 = vld [vmem:[%s390_s18 + $0x58] sm:$0xff]  ;;  %v539_v8 = vld [vmem:[%s390_s18 + $0x50] sm:$0xff]  ;;  %v534_v9 = vld [vmem:[%s390_s18 + $0x28] sm:$0xff] }
  0x24   : > { %v533_v10 = vld [vmem:[%s390_s18 + $0x20] sm:$0xff]  ;;  %v542_v11 = vld [vmem:[%s390_s18 + $0x68] sm:$0xff]  ;;  %v536_v13 = vld [vmem:[%s390_s18 + $0x38] sm:$0xff] }
  0x25   : > { %v541_v12 = vld [vmem:[%s390_s18 + $0x60] sm:$0xff]  ;;  %v535_v14 = vld [vmem:[%s390_s18 + $0x30] sm:$0xff]  ;;  %v544_v15 = vld [vmem:[%s390_s18 + $0x78] sm:$0xff] }
  0x26   : > { %593 = vperm.xlu1 %1939, %v538_v3   ;;  %v543_v16 = vld [vmem:[%s390_s18 + $0x70] sm:$0xff]  ;;  %v481_v19 = vld [vmem:[%s2234_s24 + $0x80] sm:$0xff]  ;;  %v482_v20 = vld [vmem:[%s2234_s24 + $0x88] sm:$0xff] }
  0x27   : > { %553 = vperm.xlu0 %1938, %v530_v4   ;;  %v513_v21 = vld [vmem:[%s2240_s28 + $0x80] sm:$0xff]  ;;  %v514_v22 = vld [vmem:[%s2240_s28 + $0x88] sm:$0xff]  ;;  %v483_v29 = vld [vmem:[%s2234_s24 + $0x90] sm:$0xff]  ;;  %v686_v36 = vmul.f32 %v2246_v23, %v481_v19  ;;  %v687_v37 = vmul.f32 %v2246_v23, %v482_v20 }
  0x28   : > { %v465_v24 = vld [vmem:[%s2234_s24] sm:$0xff]  ;;  %v466_v25 = vld [vmem:[%s2234_s24 + $0x8] sm:$0xff]  ;;  %v484_v30 = vld [vmem:[%s2234_s24 + $0x98] sm:$0xff]  ;;  %v719_v38 = vmul.f32 %v2251_v27, %v513_v21  ;;  %v720_v39 = vmul.f32 %v2251_v27, %v514_v22  ;;  %v688_v49 = vmul.f32 %v2246_v23, %v483_v29 }
  0x29   : > { %v497_v26 = vld [vmem:[%s2240_s28] sm:$0xff]  ;;  %v498_v28 = vld [vmem:[%s2240_s28 + $0x8] sm:$0xff]  ;;  %v515_v33 = vld [vmem:[%s2240_s28 + $0x90] sm:$0xff]  ;;  %v670_v44 = vmul.f32 %v2246_v23, %v465_v24  ;;  %v671_v45 = vmul.f32 %v2246_v23, %v466_v25  ;;  %v689_v50 = vmul.f32 %v2246_v23, %v484_v30 }
  0x2a   : > { %563 = vperm.xlu1 %1939, %v532_v5   ;;  %v516_v34 = vld [vmem:[%s2240_s28 + $0x98] sm:$0xff]  ;;  %v467_v35 = vld [vmem:[%s2234_s24 + $0x10] sm:$0xff]  ;;  %v703_v46 = vmul.f32 %v2251_v27, %v497_v26  ;;  %v704_v47 = vmul.f32 %v2251_v27, %v498_v28  ;;  %v721_v51 = vmul.f32 %v2251_v27, %v515_v33  ;;  %v469_v60 = vld [vmem:[%s2234_s24 + $0x20] sm:$0xff]  ;;  %v2296_v5 = vadd.f32 %v719_v38, %v686_v36 }
  0x2b   : > { %558 = vperm.xlu0 %1938, %v531_v6   ;;  %v468_v40 = vld [vmem:[%s2234_s24 + $0x18] sm:$0xff]  ;;  %v499_v41 = vld [vmem:[%s2240_s28 + $0x10] sm:$0xff]  ;;  %v722_v52 = vmul.f32 %v2251_v27, %v516_v34  ;;  %v672_v56 = vmul.f32 %v2246_v23, %v467_v35  ;;  %v470_v61 = vld [vmem:[%s2234_s24 + $0x28] sm:$0xff]  ;;  %v2298_v6 = vadd.f32 %v720_v39, %v687_v37  ;;  %v674_v28 = vmul.f32 %v2246_v23, %v469_v60 }
  0x2c   : > { %v500_v42 = vld [vmem:[%s2240_s28 + $0x18] sm:$0xff]  ;;  %v471_v48 = vld [vmem:[%s2234_s24 + $0x30] sm:$0xff]  ;;  %v673_v57 = vmul.f32 %v2246_v23, %v468_v40  ;;  %v705_v58 = vmul.f32 %v2251_v27, %v499_v41  ;;  %v501_v62 = vld [vmem:[%s2240_s28 + $0x20] sm:$0xff]  ;;  %v675_v29 = vmul.f32 %v2246_v23, %v470_v61 }
  0x2d   : > { %v472_v53 = vld [vmem:[%s2234_s24 + $0x38] sm:$0xff]  ;;  %v503_v54 = vld [vmem:[%s2240_s28 + $0x30] sm:$0xff]  ;;  %v706_v59 = vmul.f32 %v2251_v27, %v500_v42  ;;  %v502_v63 = vld [vmem:[%s2240_s28 + $0x28] sm:$0xff]  ;;  %v707_v30 = vmul.f32 %v2251_v27, %v501_v62 }
  0x2e   : > { %603 = vperm.xlu1 %1939, %v540_v7   ;;  %v504_v55 = vld [vmem:[%s2240_s28 + $0x38] sm:$0xff]  ;;  %v487_v2 = vld [vmem:[%s2234_s24 + $0xb0] sm:$0xff]  ;;  %v2300_v7 = vadd.f32 %v703_v46, %v670_v44  ;;  %v518_v17 = vld [vmem:[%s2240_s28 + $0xa8] sm:$0xff]  ;;  %v2316_v19 = vadd.f32 %v705_v58, %v672_v56  ;;  %v709_v21 = vmul.f32 %v2251_v27, %v503_v54  ;;  %v708_v31 = vmul.f32 %v2251_v27, %v502_v63 }
  0x2f   : > { %598 = vperm.xlu0 %1938, %v539_v8   ;;  %v488_v3 = vld [vmem:[%s2234_s24 + $0xb8] sm:$0xff]  ;;  %v519_v4 = vld [vmem:[%s2240_s28 + $0xb0] sm:$0xff]  ;;  %v2302_v8 = vadd.f32 %v704_v47, %v671_v45  ;;  %v2318_v20 = vadd.f32 %v706_v59, %v673_v57  ;;  %v710_v22 = vmul.f32 %v2251_v27, %v504_v55  ;;  %v473_v32 = vld [vmem:[%s2234_s24 + $0x40] sm:$0xff]  ;;  %v692_v35 = vmul.f32 %v2246_v23, %v487_v2 }
  0x30   : > { %v475_v18 = vld [vmem:[%s2234_s24 + $0x50] sm:$0xff]  ;;  %v476_v24 = vld [vmem:[%s2234_s24 + $0x58] sm:$0xff]  ;;  %v474_v33 = vld [vmem:[%s2234_s24 + $0x48] sm:$0xff]  ;;  %v693_v36 = vmul.f32 %v2246_v23, %v488_v3  ;;  %v725_v37 = vmul.f32 %v2251_v27, %v519_v4  ;;  %v724_v45 = vmul.f32 %v2251_v27, %v518_v17  ;;  %v678_v56 = vmul.f32 %v2246_v23, %v473_v32 }
  0x31   : > { %v507_v25 = vld [vmem:[%s2240_s28 + $0x50] sm:$0xff]  ;;  %v508_v26 = vld [vmem:[%s2240_s28 + $0x58] sm:$0xff]  ;;  %v505_v34 = vld [vmem:[%s2240_s28 + $0x40] sm:$0xff]  ;;  %v679_v57 = vmul.f32 %v2246_v23, %v474_v33  ;;  %v2376_v17 = vadd.f32 %v707_v30, %v674_v28 }
  0x32   : > { %573 = vperm.xlu1 %1939, %v534_v9   ;;  %v520_v9 = vld [vmem:[%s2240_s28 + $0xb8] sm:$0xff]  ;;  %v506_v39 = vld [vmem:[%s2240_s28 + $0x48] sm:$0xff]  ;;  %v491_v40 = vld [vmem:[%s2234_s24 + $0xd0] sm:$0xff]  ;;  %v711_v58 = vmul.f32 %v2251_v27, %v505_v34  ;;  %v2389_v34 = vadd.f32 %v725_v37, %v692_v35 }
  0x33   : > { %568 = vperm.xlu0 %1938, %v533_v10   ;;  %v485_v10 = vld [vmem:[%s2234_s24 + $0xa0] sm:$0xff]  ;;  %v726_v38 = vmul.f32 %v2251_v27, %v520_v9  ;;  %v492_v41 = vld [vmem:[%s2234_s24 + $0xd8] sm:$0xff]  ;;  %v523_v46 = vld [vmem:[%s2240_s28 + $0xd0] sm:$0xff]  ;;  %v712_v59 = vmul.f32 %v2251_v27, %v506_v39  ;;  %v696_v60 = vmul.f32 %v2246_v23, %v491_v40 }
  0x34   : > { %v690_v42 = vmul.f32 %v2246_v23, %v485_v10  ;;  %v524_v47 = vld [vmem:[%s2240_s28 + $0xd8] sm:$0xff]  ;;  %v521_v54 = vld [vmem:[%s2240_s28 + $0xc0] sm:$0xff]  ;;  %v522_v55 = vld [vmem:[%s2240_s28 + $0xc8] sm:$0xff]  ;;  %v697_v61 = vmul.f32 %v2246_v23, %v492_v41  ;;  %v729_v62 = vmul.f32 %v2251_v27, %v523_v46  ;;  %v2404_v39 = vadd.f32 %v711_v58, %v678_v56 }
  0x35   : > { %v730_v63 = vmul.f32 %v2251_v27, %v524_v47  ;;  %v727_v4 = vmul.f32 %v2251_v27, %v521_v54  ;;  %v728_v9 = vmul.f32 %v2251_v27, %v522_v55  ;;  %v479_v10 = vld [vmem:[%s2234_s24 + $0x70] sm:$0xff]  ;;  %v2384_v32 = vld [vmem:[%s2361_s11] sm:$0xff]  ;;  %v2387_v33 = vld [vmem:[%s2361_s11 + $0x8] sm:$0xff]  ;;  %v2406_v35 = vadd.f32 %v712_v59, %v679_v57 }
  0x36   : > { %613 = vperm.xlu1 %1939, %v542_v11   ;;  %v486_v11 = vld [vmem:[%s2234_s24 + $0xa8] sm:$0xff]  ;;  %v495_v37 = vld [vmem:[%s2234_s24 + $0xf0] sm:$0xff]  ;;  %v2411_v40 = vadd.f32 %v729_v62, %v696_v60  ;;  %v493_v46 = vld [vmem:[%s2234_s24 + $0xe0] sm:$0xff]  ;;  %v684_v47 = vmul.f32 %v2246_v23, %v479_v10  ;;  %vm3581_vm0 = vcmp.gt.f32.partialorder %v2384_v32, 0.0  ;;  %vm3580_vm1 = vcmp.gt.f32.partialorder %v2387_v33, 0.0 }
  0x37   : > { %608 = vperm.xlu0 %1938, %v541_v12   ;;  %v2307_v12 = vadd.f32 %v721_v51, %v688_v49  ;;  %v691_v43 = vmul.f32 %v2246_v23, %v486_v11  ;;  %v680_v49 = vmul.f32 %v2246_v23, %v475_v18  ;;  %v713_v51 = vmul.f32 %v2251_v27, %v507_v25  ;;  %v511_v25 = vld [vmem:[%s2240_s28 + $0x70] sm:$0xff]  ;;  %v478_v28 = vld [vmem:[%s2234_s24 + $0x68] sm:$0xff] }
  0x38   : > { %v2378_v18 = vadd.f32 %v708_v31, %v675_v29  ;;  %v509_v29 = vld [vmem:[%s2240_s28 + $0x60] sm:$0xff]  ;;  %v2413_v41 = vadd.f32 %v730_v63, %v697_v61  ;;  %v683_v55 = vmul.f32 %v2246_v23, %v478_v28  ;;  %v700_v58 = vmul.f32 %v2246_v23, %v495_v37  ;;  %v2451_v28 = vld [vmem:[%s2361_s11 + $0x18] sm:$0xff] }
  0x39   : > { %v2400_v30 = vadd.f32 %v713_v51, %v680_v49  ;;  %v717_v49 = vmul.f32 %v2251_v27, %v511_v25  ;;  %v494_v51 = vld [vmem:[%s2234_s24 + $0xe8] sm:$0xff]  ;;  %v715_v56 = vmul.f32 %v2251_v27, %v509_v29  ;;  %v2454_v29 = vld [vmem:[%s2361_s11 + $0x80] sm:$0xff]  ;;  %vm3578_vm3 = vcmp.gt.f32.partialorder %v2451_v28, 0.0 }
  0x3a   : > { %583 = vperm.xlu1 %1939, %v536_v13   ;;  %v2309_v13 = vadd.f32 %v722_v52, %v689_v50  ;;  %v681_v50 = vmul.f32 %v2246_v23, %v476_v24  ;;  %v714_v52 = vmul.f32 %v2251_v27, %v508_v26  ;;  %v480_v24 = vld [vmem:[%s2234_s24 + $0x78] sm:$0xff]  ;;  %vm3557_vm4 = vcmp.gt.f32.partialorder %v2454_v29, 0.0 }
  0x3b   : > { %578 = vperm.xlu0 %1938, %v535_v14   ;;  %v676_v14 = vmul.f32 %v2246_v23, %v471_v48  ;;  %v489_v48 = vld [vmem:[%s2234_s24 + $0xc0] sm:$0xff]  ;;  %v512_v26 = vld [vmem:[%s2240_s28 + $0x78] sm:$0xff] }
  0x3c   : > { %v694_v2 = vmul.f32 %v2246_v23, %v489_v48  ;;  %v2402_v31 = vadd.f32 %v714_v52, %v681_v50  ;;  %v685_v48 = vmul.f32 %v2246_v23, %v480_v24  ;;  %v718_v50 = vmul.f32 %v2251_v27, %v512_v26  ;;  %v525_v52 = vld [vmem:[%s2240_s28 + $0xe0] sm:$0xff] }
  0x3d   : > { %v2372_v11 = vadd.f32 %v709_v21, %v676_v14  ;;  %v2391_v14 = vadd.f32 %v726_v38, %v693_v36  ;;  %v2395_v21 = vadd.f32 %v724_v45, %v691_v43  ;;  %v510_v36 = vld [vmem:[%s2240_s28 + $0x68] sm:$0xff]  ;;  %v496_v38 = vld [vmem:[%s2234_s24 + $0xf8] sm:$0xff] }
  0x3e   : > { %623 = vperm.xlu1 %1939, %v544_v15   ;;  %v677_v15 = vmul.f32 %v2246_v23, %v472_v53  ;;  %v490_v53 = vld [vmem:[%s2234_s24 + $0xc8] sm:$0xff]  ;;  %v528_v45 = vld [vmem:[%s2240_s28 + $0xf8] sm:$0xff]  ;;  %v716_v57 = vmul.f32 %v2251_v27, %v510_v36  ;;  %v701_v59 = vmul.f32 %v2246_v23, %v496_v38  ;;  %v2458_v36 = vadd.f32 %v718_v50, %v685_v48 }
  0x3f   : > { %618 = vperm.xlu0 %1938, %v543_v16   ;;  %v517_v16 = vld [vmem:[%s2240_s28 + $0xa0] sm:$0xff]  ;;  %v695_v3 = vmul.f32 %v2246_v23, %v490_v53  ;;  %v526_v53 = vld [vmem:[%s2240_s28 + $0xe8] sm:$0xff]  ;;  %v734_v61 = vmul.f32 %v2251_v27, %v528_v45 }
  0x40   : > { %v723_v44 = vmul.f32 %v2251_v27, %v517_v16  ;;  %v2374_v16 = vadd.f32 %v710_v22, %v677_v15  ;;  %v477_v22 = vld [vmem:[%s2234_s24 + $0x60] sm:$0xff]  ;;  %v2467_v45 = vld [vmem:[%s2361_s11 + $0x88] sm:$0xff] }
  0x41   : > { %v2417_v43 = vadd.f32 %v728_v9, %v695_v3  ;;  %v682_v54 = vmul.f32 %v2246_v23, %v477_v22  ;;  %v699_v3 = vmul.f32 %v2246_v23, %v494_v51  ;;  %v732_v9 = vmul.f32 %v2251_v27, %v526_v53  ;;  %v2448_v22 = vld [vmem:[%s2361_s11 + $0x10] sm:$0xff] }
  0x42   : > { %v2393_v15 = vadd.f32 %v723_v44, %v690_v42  ;;  %v2415_v42 = vadd.f32 %v727_v4, %v694_v2  ;;  %v527_v44 = vld [vmem:[%s2240_s28 + $0xf0] sm:$0xff]  ;;  %v698_v2 = vmul.f32 %v2246_v23, %v493_v46  ;;  %v731_v4 = vmul.f32 %v2251_v27, %v525_v52 }
  0x43   : > { %v733_v60 = vmul.f32 %v2251_v27, %v527_v44  ;;  %v2456_v23 = vadd.f32 %v717_v49, %v684_v47  ;;  %v2460_v37 = vadd.f32 %v715_v56, %v682_v54  ;;  %v2462_v27 = vadd.f32 %v716_v57, %v683_v55 }
  0x44   : > { %v2471_v51 = vadd.f32 %v734_v61, %v701_v59  ;;  %v2479_v50 = vadd.f32 %v731_v4, %v698_v2  ;;  %v2481_v53 = vadd.f32 %v732_v9, %v699_v3  ;;  %vm3579_vm2 = vcmp.gt.f32.partialorder %v2448_v22, 0.0  ;;  %v2502_v2 = vld [vmem:[%s2361_s11 + $0x20] sm:$0xff]  ;;  %v2509_v4 = vld [vmem:[%s2361_s11 + $0x28] sm:$0xff]  ;;  %v2515_v9 = vld [vmem:[%s2361_s11 + $0x98] sm:$0xff] }
  0x45   : > { %v2469_v46 = vadd.f32 %v733_v60, %v700_v58  ;;  %vm3556_vm7 = vcmp.gt.f32.partialorder %v2467_v45, 0.0  ;;  %3594 = vst [vmem:[#allocation5_spill] sm:$0xff] %v2509_v4  ;;  %3596 = vst [vmem:[#allocation7_spill] sm:$0xff] %v2515_v9  ;;  %vm3561_vm12 = vcmp.gt.f32.partialorder %v2502_v2, 0.0  ;;  %vm3560_vm13 = vcmp.gt.f32.partialorder %v2509_v4, 0.0 }
  0x46   : > { %vm3558_vm15 = vcmp.gt.f32.partialorder %v2515_v9, 0.0 }
  0x9d   : > { %v589_v62 = vpop.permute.xlu1 %588 }
  0x9e   : > { %v549_v63 = vpop.permute.xlu0 %548  ;;  %v653_v10 = vadd.f32 %v2289_v0, %v589_v62  ;;  %v654_v24 = vadd.f32 %v2291_v1, %v589_v62 }
  0x9f   : > { %v637_v25 = vadd.f32 %v2289_v0, %v549_v63  ;;  %v638_v26 = vadd.f32 %v2291_v1, %v549_v63 }
  0xa0   : > { %v2474_v52 = vadd.f32 %v2296_v5, %v653_v10  ;;  %v2477_v47 = vadd.f32 %v2298_v6, %v654_v24 }
  0xa1   : > { %v767_v38 = vadd.f32 %v2300_v7, %v637_v25  ;;  %v768_v44 = vadd.f32 %v2302_v8, %v638_v26  ;;  %v594_v48 = vpop.permute.xlu1 %593 }
  0xa2   : > { %v554_v49 = vpop.permute.xlu0 %553  ;;  %v655_v7 = vadd.f32 %v2289_v0, %v594_v48  ;;  %v656_v8 = vadd.f32 %v2291_v1, %v594_v48  ;;  %vm815_vm8 = vcmp.ge.f32.partialorder %v2474_v52, 0.0  ;;  %vm816_vm9 = vcmp.ge.f32.partialorder %v2477_v47, 0.0 }
  0xa3   : > { %v639_v54 = vadd.f32 %v2289_v0, %v554_v49  ;;  %v640_v55 = vadd.f32 %v2291_v1, %v554_v49  ;;  %vm799_vm5 = vcmp.ge.f32.partialorder %v767_v38, 0.0  ;;  %vm800_vm6 = vcmp.ge.f32.partialorder %v768_v44, 0.0 }
  0xa4   : > { %v831_v5 = vmul.f32 0.01, %v767_v38  ;;  %v832_v6 = vmul.f32 0.01, %v768_v44  ;;  %v2492_v56 = vadd.f32 %v2307_v12, %v655_v7  ;;  %v2495_v57 = vadd.f32 %v2309_v13, %v656_v8 }
  0xa5   : > { %v769_v58 = vadd.f32 %v2316_v19, %v639_v54  ;;  %v770_v59 = vadd.f32 %v2318_v20, %v640_v55  ;;  %v564_v60 = vpop.permute.xlu1 %563  ;;  %v2512_v20 = vld [vmem:[%s2361_s11 + $0x90] sm:$0xff] }
  0xa6   : > { %v559_v61 = vpop.permute.xlu0 %558  ;;  %v863_v62 = vsel %vm799_vm5, %v767_v38, %v831_v5  ;;  %v864_v63 = vsel %vm800_vm6, %v768_v44, %v832_v6  ;;  %v643_v12 = vadd.f32 %v2289_v0, %v564_v60  ;;  %v644_v13 = vadd.f32 %v2291_v1, %v564_v60  ;;  %3595 = vst [vmem:[#allocation6_spill] sm:$0xff] %v2512_v20 }
  0xa7   : > { %v641_v3 = vadd.f32 %v2289_v0, %v559_v61  ;;  %v642_v19 = vadd.f32 %v2291_v1, %v559_v61  ;;  %v2519_v10 = vsel %vm3581_vm0, %v863_v62, -1e+30  ;;  %v2523_v24 = vsel %vm3580_vm1, %v864_v63, -1e+30 }
  0xa8   : > { %vm801_vm10 = vcmp.ge.f32.partialorder %v769_v58, 0.0  ;;  %vm802_vm11 = vcmp.ge.f32.partialorder %v770_v59, 0.0  ;;  %v2526_v25 = vadd.f32 %v2372_v11, %v643_v12  ;;  %v2529_v26 = vadd.f32 %v2374_v16, %v644_v13  ;;  %v2568_v13 = vld [vmem:[%s2361_s11 + $0xa8] sm:$0xff] }
  0xa9   : > { %v771_v38 = vadd.f32 %v2376_v17, %v641_v3  ;;  %v2533_v44 = vadd.f32 %v2378_v18, %v642_v19  ;;  %v927_v48 = vmax.f32 %v2519_v10, %v2523_v24  ;;  %v604_v49 = vpop.permute.xlu1 %603  ;;  %v833_v8 = vmul.f32 0.01, %v769_v58  ;;  %3598 = vst [vmem:[#allocation9_spill] sm:$0xff] %v2568_v13  ;;  %v2571_v3 = vld [vmem:[%s2361_s11 + $0x30] sm:$0xff] }
  0xaa   : > { %v599_v7 = vpop.permute.xlu0 %598  ;;  %v834_v54 = vmul.f32 0.01, %v770_v59  ;;  %v847_v11 = vmul.f32 0.01, %v2474_v52  ;;  %v659_v16 = vadd.f32 %v2289_v0, %v604_v49  ;;  %v660_v17 = vadd.f32 %v2291_v1, %v604_v49  ;;  %3599 = vst [vmem:[#allocation10_spill] sm:$0xff] %v2571_v3 }
  0xab   : > { %v657_v18 = vadd.f32 %v2289_v0, %v599_v7  ;;  %v658_v55 = vadd.f32 %v2291_v1, %v599_v7  ;;  %vm3559_vm14 = vcmp.gt.f32.partialorder %v2512_v20, 0.0  ;;  %928 = vmax.xlane.f32.xlu0 %v927_v48  ;;  %v865_v5 = vsel %vm801_vm10, %v769_v58, %v833_v8 }
  0xac   : > { %v866_v6 = vsel %vm802_vm11, %v770_v59, %v834_v54  ;;  %v848_v60 = vmul.f32 0.01, %v2477_v47  ;;  %v879_v61 = vsel %vm815_vm8, %v2474_v52, %v847_v11  ;;  %v2553_v62 = vadd.f32 %v2389_v34, %v659_v16  ;;  %v2565_v59 = vld [vmem:[%s2361_s11 + $0xa0] sm:$0xff]  ;;  %v2597_v54 = vld [vmem:[%s2361_s11 + $0x38] sm:$0xff] }
  0xad   : > { %v2556_v63 = vadd.f32 %v2391_v14, %v660_v17  ;;  %v2559_v12 = vadd.f32 %v2393_v15, %v657_v18  ;;  %v2562_v58 = vadd.f32 %v2395_v21, %v658_v55  ;;  %3597 = vst [vmem:[#allocation8_spill] sm:$0xff] %v2565_v59  ;;  %v2575_v34 = vsel %vm3579_vm2, %v865_v5, -1e+30  ;;  %v574_v52 = vpop.permute.xlu1 %573  ;;  %3600 = vst [vmem:[#allocation11_spill] sm:$0xff] %v2597_v54 }
  0xae   : > { %v2579_v14 = vsel %vm3578_vm3, %v866_v6, -1e+30  ;;  %v880_v15 = vsel %vm816_vm9, %v2477_v47, %v848_v60  ;;  %v2586_v21 = vsel %vm3557_vm4, %v879_v61, -1e+30  ;;  %v569_v19 = vpop.permute.xlu0 %568  ;;  %v647_v7 = vadd.f32 %v2289_v0, %v574_v52 }
  0xaf   : > { %v930_v48 = vmax.f32 %v2575_v34, %v2579_v14  ;;  %v2592_v49 = vsel %vm3556_vm7, %v880_v15, -1e+30  ;;  %v648_v8 = vadd.f32 %v2291_v1, %v574_v52  ;;  %v645_v11 = vadd.f32 %v2289_v0, %v569_v19 }
  0xb0   : > { %v951_v47 = vmax.f32 %v2586_v21, %v2592_v49  ;;  %v646_v16 = vadd.f32 %v2291_v1, %v569_v19  ;;  %vm803_vm5 = vcmp.ge.f32.partialorder %v771_v38, 0.0  ;;  %vm3570_vm6 = vcmp.gt.f32.partialorder %v2565_v59, 0.0 }
  0xb1   : > { %vm3567_vm8 = vcmp.gt.f32.partialorder %v2568_v13, 0.0  ;;  %931 = vmax.xlane.f32.xlu1 %v930_v48  ;;  %v2606_v17 = vadd.f32 %v2400_v30, %v647_v7  ;;  %v2609_v18 = vadd.f32 %v2402_v31, %v648_v8  ;;  %vm804_vm9 = vcmp.ge.f32.partialorder %v2533_v44, 0.0  ;;  %v614_v31 = vpop.permute.xlu1 %613  ;;  %v2639_v7 = vld [vmem:[%s2361_s11 + $0x48] sm:$0xff] }
  0xb2   : > { %v835_v55 = vmul.f32 0.01, %v771_v38  ;;  %vm3566_vm10 = vcmp.gt.f32.partialorder %v2571_v3, 0.0  ;;  %952 = vmax.xlane.f32.xlu0 %v951_v47  ;;  %v2614_v5 = vadd.f32 %v2404_v39, %v645_v11  ;;  %v2617_v6 = vadd.f32 %v2406_v35, %v646_v16  ;;  %v609_v60 = vpop.permute.xlu0 %608  ;;  %v2627_v35 = vld [vmem:[%s2361_s11 + $0x40] sm:$0xff]  ;;  %v2649_v16 = vld [vmem:[%s2361_s11 + $0xb0] sm:$0xff] }
  0xb3   : > { %v836_v30 = vmul.f32 0.01, %v2533_v44  ;;  %vm817_vm11 = vcmp.ge.f32.partialorder %v2492_v56, 0.0  ;;  %vm3565_vm7 = vcmp.gt.f32.partialorder %v2597_v54, 0.0  ;;  %vm818_vm4 = vcmp.ge.f32.partialorder %v2495_v57, 0.0  ;;  %v2759_v54 = vld [vmem:[%s2361_s11 + $0xd0] sm:$0xff] }
  0xb4   : > { %v867_v61 = vsel %vm803_vm5, %v771_v38, %v835_v55  ;;  %v849_v39 = vmul.f32 0.01, %v2492_v56  ;;  %v850_v15 = vmul.f32 0.01, %v2495_v57  ;;  %v663_v48 = vadd.f32 %v2289_v0, %v614_v31  ;;  %v2652_v55 = vld [vmem:[%s2361_s11 + $0xb8] sm:$0xff] }
  0xb5   : > { %v868_v52 = vsel %vm804_vm9, %v2533_v44, %v836_v30  ;;  %v2634_v19 = vsel %vm3561_vm12, %v867_v61, -1e+30  ;;  %v664_v38 = vadd.f32 %v2291_v1, %v614_v31  ;;  %v661_v44 = vadd.f32 %v2289_v0, %v609_v60  ;;  %3601 = vst [vmem:[#allocation12_spill] sm:$0xff] %v2652_v55 }
  0xb6   : > { %v2643_v8 = vsel %vm3560_vm13, %v868_v52, -1e+30  ;;  %v881_v47 = vsel %vm817_vm11, %v2492_v56, %v849_v39  ;;  %v882_v11 = vsel %vm818_vm4, %v2495_v57, %v850_v15  ;;  %v2665_v56 = vadd.f32 %v2411_v40, %v663_v48  ;;  %v579_v48 = vpop.permute.xlu0 %578 }
  0xb7   : > { %v933_v30 = vmax.f32 %v2634_v19, %v2643_v8  ;;  %v2658_v31 = vsel %vm3559_vm14, %v881_v47, -1e+30  ;;  %v2662_v61 = vsel %vm3558_vm15, %v882_v11, -1e+30  ;;  %vm3577_vm4 = vcmp.gt.f32.partialorder %v2627_v35, 0.0  ;;  %v584_v47 = vpop.permute.xlu1 %583 }
  0xb8   : > { %v954_v57 = vmax.f32 %v2658_v31, %v2662_v61  ;;  %v2671_v39 = vadd.f32 %v2413_v41, %v664_v38  ;;  %v662_v15 = vadd.f32 %v2291_v1, %v609_v60  ;;  %v2675_v52 = vadd.f32 %v2415_v42, %v661_v44 }
  0xb9   : > { %vm3576_vm5 = vcmp.gt.f32.partialorder %v2639_v7, 0.0  ;;  %934 = vmax.xlane.f32.xlu1 %v933_v30  ;;  %vm819_vm9 = vcmp.ge.f32.partialorder %v2559_v12, 0.0  ;;  %vm820_vm11 = vcmp.ge.f32.partialorder %v2562_v58, 0.0  ;;  %v851_v40 = vmul.f32 0.01, %v2559_v12 }
  0xba   : > { %v852_v41 = vmul.f32 0.01, %v2562_v58  ;;  %vm3575_vm15 = vcmp.gt.f32.partialorder %v2649_v16, 0.0  ;;  %vm3574_vm14 = vcmp.gt.f32.partialorder %v2652_v55, 0.0  ;;  %955 = vmax.xlane.f32.xlu0 %v954_v57  ;;  %v2685_v42 = vadd.f32 %v2417_v43, %v662_v15  ;;  %v2695_v57 = vld [vmem:[%s2361_s11 + $0xc0] sm:$0xff]  ;;  %v2698_v43 = vld [vmem:[%s2361_s11 + $0xc8] sm:$0xff] }
  0xbb   : > { %vm805_vm13 = vcmp.ge.f32.partialorder %v2526_v25, 0.0  ;;  %vm806_vm12 = vcmp.ge.f32.partialorder %v2529_v26, 0.0  ;;  %v837_v60 = vmul.f32 0.01, %v2526_v25  ;;  %v883_v38 = vsel %vm819_vm9, %v2559_v12, %v851_v40  ;;  %3602 = vst [vmem:[#allocation13_spill] sm:$0xff] %v2698_v43  ;;  %v2711_v40 = vld [vmem:[%s2361_s11 + $0x50] sm:$0xff] }
  0xbc   : > { %v884_v11 = vsel %vm820_vm11, %v2562_v58, %v852_v41  ;;  %v838_v44 = vmul.f32 0.01, %v2529_v26  ;;  %v651_v30 = vadd.f32 %v2289_v0, %v584_v47  ;;  %v2702_v15 = vsel %vm3570_vm6, %v883_v38, -1e+30  ;;  %3603 = vst [vmem:[#allocation14_spill] sm:$0xff] %v2711_v40  ;;  %v2817_v55 = vld [vmem:[%s2361_s11 + $0x70] sm:$0xff] }
  0xbd   : > { %v2706_v9 = vsel %vm3567_vm8, %v884_v11, -1e+30  ;;  %v869_v12 = vsel %vm805_vm13, %v2526_v25, %v837_v60  ;;  %v652_v58 = vadd.f32 %v2291_v1, %v584_v47  ;;  %v2724_v11 = vld [vmem:[%s2361_s11 + $0x58] sm:$0xff]  ;;  %v649_v60 = vadd.f32 %v2289_v0, %v579_v48 }
  0xbe   : > { %v957_v41 = vmax.f32 %v2702_v15, %v2706_v9  ;;  %v870_v20 = vsel %vm806_vm12, %v2529_v26, %v838_v44  ;;  %v2718_v59 = vsel %vm3566_vm10, %v869_v12, -1e+30  ;;  %v2721_v38 = vadd.f32 %v2456_v23, %v651_v30  ;;  %3604 = vst [vmem:[#allocation15_spill] sm:$0xff] %v2724_v11 }
  0xbf   : > { %v2728_v25 = vsel %vm3565_vm7, %v870_v20, -1e+30  ;;  %v2731_v47 = vadd.f32 %v2458_v36, %v652_v58  ;;  %v650_v26 = vadd.f32 %v2291_v1, %v579_v48  ;;  %vm3583_vm12 = vcmp.gt.f32.partialorder %v2695_v57, 0.0  ;;  %v624_v20 = vpop.permute.xlu1 %623  ;;  %v2744_v48 = vld [vmem:[%s2361_s11 + $0x60] sm:$0xff]  ;;  %v619_v58 = vpop.permute.xlu0 %618 }
  0xc0   : > { %vm3582_vm13 = vcmp.gt.f32.partialorder %v2698_v43, 0.0  ;;  %958 = vmax.xlane.f32.xlu1 %v957_v41  ;;  %v936_v23 = vmax.f32 %v2718_v59, %v2728_v25  ;;  %vm807_vm9 = vcmp.ge.f32.partialorder %v2614_v5, 0.0  ;;  %vm808_vm11 = vcmp.ge.f32.partialorder %v2617_v6, 0.0  ;;  %v2756_v41 = vld [vmem:[%s2361_s11 + $0x68] sm:$0xff] }
  0xc1   : > { %v839_v36 = vmul.f32 0.01, %v2614_v5  ;;  %vm3586_vm7 = vcmp.gt.f32.partialorder %v2711_v40, 0.0  ;;  %v2747_v44 = vadd.f32 %v2460_v37, %v649_v60  ;;  %v2750_v30 = vadd.f32 %v2462_v27, %v650_v26  ;;  %v2766_v60 = vld [vmem:[%s2361_s11 + $0xd8] sm:$0xff] }
  0xc2   : > { %v840_v12 = vmul.f32 0.01, %v2617_v6  ;;  %vm821_vm10 = vcmp.ge.f32.partialorder %v2553_v62, 0.0  ;;  %vm3585_vm8 = vcmp.gt.f32.partialorder %v2724_v11, 0.0  ;;  %937 = vmax.xlane.f32.xlu0 %v936_v23  ;;  %vm822_vm6 = vcmp.ge.f32.partialorder %v2556_v63, 0.0 }
  0xc3   : > { %v871_v3 = vsel %vm807_vm9, %v2614_v5, %v839_v36  ;;  %v853_v37 = vmul.f32 0.01, %v2553_v62  ;;  %v854_v27 = vmul.f32 0.01, %v2556_v63  ;;  %v667_v23 = vadd.f32 %v2289_v0, %v624_v20 }
  0xc4   : > { %v872_v26 = vsel %vm808_vm11, %v2617_v6, %v840_v12  ;;  %v2773_v13 = vsel %vm3577_vm4, %v871_v3, -1e+30  ;;  %v668_v5 = vadd.f32 %v2291_v1, %v624_v20  ;;  %vm445_vm9 = vcmp.gt.f32.partialorder %v2744_v48, 0.0  ;;  %v2789_v12 = vld [vmem:[%s2361_s11 + $0xe0] sm:$0xff] }
  0xc5   : > { %v2780_v36 = vsel %vm3576_vm5, %v872_v26, -1e+30  ;;  %v885_v4 = vsel %vm821_vm10, %v2553_v62, %v853_v37  ;;  %v886_v6 = vsel %vm822_vm6, %v2556_v63, %v854_v27  ;;  %v665_v3 = vadd.f32 %v2289_v0, %v619_v58  ;;  %v2807_v0 = vld [vmem:[%s2361_s11 + $0xe8] sm:$0xff] }
  0xc6   : > { %vm446_vm11 = vcmp.gt.f32.partialorder %v2756_v41, 0.0  ;;  %v939_v20 = vmax.f32 %v2773_v13, %v2780_v36  ;;  %v2795_v26 = vsel %vm3575_vm15, %v885_v4, -1e+30  ;;  %v2799_v62 = vsel %vm3574_vm14, %v886_v6, -1e+30 }
  0xc7   : > { %v2802_v63 = vadd.f32 %v2469_v46, %v667_v23  ;;  %vm459_vm6 = vcmp.gt.f32.partialorder %v2759_v54, 0.0  ;;  %vm460_vm10 = vcmp.gt.f32.partialorder %v2766_v60, 0.0  ;;  %v960_v37 = vmax.f32 %v2795_v26, %v2799_v62  ;;  %v2820_v46 = vld [vmem:[%s2361_s11 + $0x78] sm:$0xff] }
  0xc8   : > { %v2812_v27 = vadd.f32 %v2471_v51, %v668_v5  ;;  %v666_v4 = vadd.f32 %v2291_v1, %v619_v58  ;;  %v795_v6 = vadd.f32 %v2479_v50, %v665_v3  ;;  %3605 = vst [vmem:[#allocation16_spill] sm:$0xff] %v2820_v46  ;;  %940 = vmax.xlane.f32.xlu1 %v939_v20  ;;  %vm823_vm14 = vcmp.ge.f32.partialorder %v2675_v52, 0.0  ;;  %v2837_v20 = vld [vmem:[%s2361_s11 + $0xf0] sm:$0xff] }
  0xc9   : > { %vm824_vm15 = vcmp.ge.f32.partialorder %v2685_v42, 0.0  ;;  %v855_v23 = vmul.f32 0.01, %v2675_v52  ;;  %v856_v51 = vmul.f32 0.01, %v2685_v42  ;;  %vm461_vm5 = vcmp.gt.f32.partialorder %v2789_v12, 0.0  ;;  %961 = vmax.xlane.f32.xlu0 %v960_v37 }
  0xca   : > { %v796_v1 = vadd.f32 %v2481_v53, %v666_v4  ;;  %vm809_vm4 = vcmp.ge.f32.partialorder %v2606_v17, 0.0  ;;  %vm810_vm3 = vcmp.ge.f32.partialorder %v2609_v18, 0.0  ;;  %v841_v50 = vmul.f32 0.01, %v2606_v17  ;;  %3606 = vst [vmem:[#allocation17_spill] sm:$0xff] %v2837_v20  ;;  %v2840_v37 = vld [vmem:[%s2361_s11 + $0xf8] sm:$0xff] }
  0xcb   : > { %vm462_vm2 = vcmp.gt.f32.partialorder %v2807_v0, 0.0  ;;  %v887_v58 = vsel %vm823_vm14, %v2675_v52, %v855_v23  ;;  %v888_v5 = vsel %vm824_vm15, %v2685_v42, %v856_v51  ;;  %v842_v3 = vmul.f32 0.01, %v2609_v18  ;;  %3607 = vst [vmem:[#allocation18_spill] sm:$0xff] %v2840_v37  ;;  %v1952_v12 = vld [vmem:[%s3553_s6 + $0x48] sm:$0xff]  }
  0xcc   : > { %vm811_vm1 = vcmp.ge.f32.partialorder %v2747_v44, 0.0  ;;  %v2844_v53 = vsel %vm3583_vm12, %v887_v58, -1e+30  ;;  %v2848_v4 = vsel %vm3582_vm13, %v888_v5, -1e+30  ;;  %v873_v52 = vsel %vm809_vm4, %v2606_v17, %v841_v50  ;;  %v1953_v0 = vld [vmem:[%s3553_s6 + $0x8] sm:$0xff]  }
  0xcd   : > { %vm812_vm14 = vcmp.ge.f32.partialorder %v2750_v30, 0.0  ;;  %vm447_vm15 = vcmp.gt.f32.partialorder %v2817_v55, 0.0  ;;  %vm448_vm0 = vcmp.gt.f32.partialorder %v2820_v46, 0.0  ;;  %v963_v42 = vmax.f32 %v2844_v53, %v2848_v4 }
  0xce   : > { %v874_v23 = vsel %vm810_vm3, %v2609_v18, %v842_v3  ;;  %v2861_v51 = vsel %vm3586_vm7, %v873_v52, -1e+30  ;;  %v843_v58 = vmul.f32 0.01, %v2747_v44  ;;  %v844_v50 = vmul.f32 0.01, %v2750_v30 }
  0xcf   : > { %v2866_v17 = vsel %vm3585_vm8, %v874_v23, -1e+30  ;;  %vm825_vm4 = vcmp.ge.f32.partialorder %v2665_v56, 0.0  ;;  %vm826_vm13 = vcmp.ge.f32.partialorder %v2671_v39, 0.0  ;;  %vm463_vm12 = vcmp.gt.f32.partialorder %v2837_v20, 0.0  ;;  %964 = vmax.xlane.f32.xlu1 %v963_v42 }
  0xd0   : > { %vm464_vm3 = vcmp.gt.f32.partialorder %v2840_v37, 0.0  ;;  %v942_v18 = vmax.f32 %v2861_v51, %v2866_v17  ;;  %v875_v5 = vsel %vm811_vm1, %v2747_v44, %v843_v58  ;;  %v857_v3 = vmul.f32 0.01, %v2665_v56 }
  0xd1   : > { %v858_v52 = vmul.f32 0.01, %v2671_v39  ;;  %v876_v23 = vsel %vm812_vm14, %v2750_v30, %v844_v50  ;;  %v2885_v11 = vsel %vm445_vm9, %v875_v5, -1e+30  ;;  %vm827_vm8 = vcmp.ge.f32.partialorder %v795_v6, 0.0 }
  0xd2   : > { %vm828_vm7 = vcmp.ge.f32.partialorder %v796_v1, 0.0  ;;  %943 = vmax.xlane.f32.xlu0 %v942_v18  ;;  %v2889_v42 = vsel %vm446_vm11, %v876_v23, -1e+30  ;;  %v889_v44 = vsel %vm825_vm4, %v2665_v56, %v857_v3  ;;  %v859_v40 = vmul.f32 0.01, %v795_v6 }
  0xd3   : > { %v890_v58 = vsel %vm826_vm13, %v2671_v39, %v858_v52  ;;  %v945_v43 = vmax.f32 %v2885_v11, %v2889_v42  ;;  %v2897_v30 = vsel %vm459_vm6, %v889_v44, -1e+30  ;;  %v860_v18 = vmul.f32 0.01, %v796_v1 }
  0xd4   : > { %v2901_v50 = vsel %vm460_vm10, %v890_v58, -1e+30  ;;  %v891_v23 = vsel %vm827_vm8, %v795_v6, %v859_v40  ;;  %vm813_vm1 = vcmp.ge.f32.partialorder %v2721_v38, 0.0  ;;  %vm814_vm13 = vcmp.ge.f32.partialorder %v2731_v47, 0.0 }
  0xd5   : > { %v966_v5 = vmax.f32 %v2897_v30, %v2901_v50  ;;  %946 = vmax.xlane.f32.xlu1 %v945_v43  ;;  %v892_v56 = vsel %vm828_vm7, %v796_v1, %v860_v18  ;;  %v2909_v39 = vsel %vm461_vm5, %v891_v23, -1e+30  ;;  %v845_v3 = vmul.f32 0.01, %v2721_v38 }
  0xd6   : > { %v846_v52 = vmul.f32 0.01, %v2731_v47  ;;  %v2915_v44 = vsel %vm462_vm2, %v892_v56, -1e+30  ;;  %vm829_vm8 = vcmp.ge.f32.partialorder %v2802_v63, 0.0  ;;  %vm830_vm14 = vcmp.ge.f32.partialorder %v2812_v27, 0.0 }
  0xd7   : > { %967 = vmax.xlane.f32.xlu0 %v966_v5  ;;  %v861_v43 = vmul.f32 0.01, %v2802_v63  ;;  %v969_v40 = vmax.f32 %v2909_v39, %v2915_v44  ;;  %v877_v6 = vsel %vm813_vm1, %v2721_v38, %v845_v3  ;;  %v862_v58 = vmul.f32 0.01, %v2812_v27 }
  0xd8   : > { %v878_v1 = vsel %vm814_vm13, %v2731_v47, %v846_v52  ;;  %v2927_v18 = vsel %vm447_vm15, %v877_v6, -1e+30  ;;  %vm3608_vm7 = vcmp.gt.f32.partialorder %v2384_v32, 0.0  ;;  %vm3609_vm4 = vcmp.gt.f32.partialorder %v2387_v33, 0.0 }
  0xd9   : > { %v2931_v5 = vsel %vm448_vm0, %v878_v1, -1e+30  ;;  %v893_v23 = vsel %vm829_vm8, %v2802_v63, %v861_v43  ;;  %970 = vmax.xlane.f32.xlu1 %v969_v40  ;;  %v894_v38 = vsel %vm830_vm14, %v2812_v27, %v862_v58  ;;  %v1940_v63 = vld [vmem:[%s3553_s6 + $0x78] sm:$0xff]   ;;  %v1942_v43 = vld [vmem:[%s3553_s6 + $0x70] sm:$0xff]   ;;  %vm3610_vm1 = vcmp.gt.f32.partialorder %v2448_v22, 0.0 }
  0xda   : > { %v948_v56 = vmax.f32 %v2927_v18, %v2931_v5  ;;  %v2939_v47 = vsel %vm463_vm12, %v893_v23, -1e+30  ;;  %v2943_v3 = vsel %vm464_vm3, %v894_v38, -1e+30  ;;  %v1941_v27 = vld [vmem:[%s3553_s6 + $0x38] sm:$0xff]   ;;  %1838 = vmatprep.subr.bf16.mxu0 %v1940_v63  ;;  %1902 = vmatprep.subr.bf16.mxu1 %v1940_v63  ;;  %v1943_v40 = vld [vmem:[%s3553_s6 + $0x30] sm:$0xff]  }
  0xdb   : > { %v972_v52 = vmax.f32 %v2939_v47, %v2943_v3  ;;  %1839 = vmatpush3.bf16.msra.mxu0 %v1941_v27  ;;  %1910 = vmatpush3.bf16.msra.mxu1 %v1941_v27  ;;  %vm3611_vm13 = vcmp.gt.f32.partialorder %v2451_v28, 0.0  ;;  %vm3612_vm8 = vcmp.gt.f32.partialorder %v2454_v29, 0.0  ;;  %vm3613_vm14 = vcmp.gt.f32.partialorder %v2467_v45, 0.0 }
  0xdc   : > { %949 = vmax.xlane.f32.xlu0 %v948_v56  ;;  %1840 = vmatprep.subr.bf16.mxu0 %v1942_v43 }
  0xdd   : > { %1903 = vmatprep.subr.bf16.mxu1 %v1942_v43 }
  0xdf   : > { %1841 = vmatpush3.bf16.msra.mxu0 %v1943_v40  ;;  %1911 = vmatpush3.bf16.msra.mxu1 %v1943_v40 }
  0xe0   : > { %973 = vmax.xlane.f32.xlu0 %v972_v52 }
 0x134   : > { %v929_v6 = vpop.xlane.xlu0 %928 }
 0x135   : > { %v975_v1 = vsub.f32 %v2519_v10, %v929_v6  ;;  %v976_v58 = vsub.f32 %v2523_v24, %v929_v6 }
 0x137   : > { %v1007_v23 = vmul.f32 1.442695, %v975_v1  ;;  %v1009_v56 = vmul.f32 1.442695, %v976_v58 }
 0x139   : > { %1956 = vpow2.f32 %v1007_v23 }
 0x13a   : > { %v932_v38 = vpop.xlane.xlu1 %931  ;;  %1958 = vpow2.f32 %v1009_v56 }
 0x13b   : > { %v977_v52 = vsub.f32 %v2575_v34, %v932_v38  ;;  %v978_v63 = vsub.f32 %v2579_v14, %v932_v38  ;;  %v953_v27 = vpop.xlane.xlu0 %952 }
 0x13c   : > { %v991_v37 = vsub.f32 %v2586_v21, %v953_v27  ;;  %v992_v43 = vsub.f32 %v2592_v49, %v953_v27 }
 0x13d   : > { %v1011_v40 = vmul.f32 1.442695, %v977_v52  ;;  %v1013_v20 = vmul.f32 1.442695, %v978_v63 }
 0x13e   : > { %v1039_v46 = vmul.f32 1.442695, %v991_v37  ;;  %v1041_v10 = vmul.f32 1.442695, %v992_v43 }
 0x13f   : > { %1960 = vpow2.f32 %v1011_v40 }
 0x140   : > { %1962 = vpow2.f32 %v1013_v20 }
 0x141   : > { %1964 = vpow2.f32 %v1039_v46 }
 0x142   : > { %v935_v24 = vpop.xlane.xlu1 %934  ;;  %1966 = vpow2.f32 %v1041_v10 }
 0x143   : > { %v979_v6 = vsub.f32 %v2634_v19, %v935_v24  ;;  %v980_v34 = vsub.f32 %v2643_v8, %v935_v24  ;;  %v956_v1 = vpop.xlane.xlu0 %955 }
 0x144   : > { %v993_v14 = vsub.f32 %v2658_v31, %v956_v1  ;;  %v994_v21 = vsub.f32 %v2662_v61, %v956_v1 }
 0x145   : > { %v1015_v58 = vmul.f32 1.442695, %v979_v6  ;;  %v1017_v49 = vmul.f32 1.442695, %v980_v34 }
 0x146   : > { %v1043_v23 = vmul.f32 1.442695, %v993_v14  ;;  %v1045_v56 = vmul.f32 1.442695, %v994_v21  ;;  %v1957_v37 = vpop.eup %1956 }
 0x147   : > { %1968 = vpow2.f32 %v1015_v58  ;;  %v1959_v46 = vpop.eup %1958  ;;  %v2973_v8 = vsel %vm3608_vm7, %v1957_v37, 0.0  ;;  %vm3614_vm7 = vcmp.gt.f32.partialorder %v2502_v2, 0.0 }
 0x148   : > { %1970 = vpow2.f32 %v1017_v49  ;;  %v2977_v61 = vsel %vm3609_vm4, %v1959_v46, 0.0 }
 0x149   : > { %v959_v20 = vpop.xlane.xlu1 %958  ;;  %1972 = vpow2.f32 %v1043_v23 }
 0x14a   : > { %v995_v38 = vsub.f32 %v2702_v15, %v959_v20  ;;  %v996_v19 = vsub.f32 %v2706_v9, %v959_v20  ;;  %1974 = vpow2.f32 %v1045_v56  ;;  %v1103_v15 = vadd.f32 %v2977_v61, %v2973_v8 }
 0x14b   : > { %v938_v31 = vpop.xlane.xlu0 %937 }
 0x14c   : > { %v1047_v52 = vmul.f32 1.442695, %v995_v38  ;;  %v1049_v63 = vmul.f32 1.442695, %v996_v19  ;;  %v981_v27 = vsub.f32 %v2718_v59, %v938_v31  ;;  %v982_v43 = vsub.f32 %v2728_v25, %v938_v31  ;;  %v1961_v9 = vpop.eup %1960  ;;  %1104 = vadd.xlane.f32.xlu1 %v1103_v15  ;;  %v3615_v19 = vld [vmem:[#allocation5_spill] sm:$0xff] }
 0x14d   : > { %v1963_v10 = vpop.eup %1962  ;;  %v2985_v33 = vsel %vm3610_vm1, %v1961_v9, 0.0  ;;  %vm3616_vm4 = vcmp.gt.f32.partialorder %v3615_v19, 0.0  ;;  %v3627_v19 = vld [vmem:[#allocation11_spill] sm:$0xff] }
 0x14e   : > { %1976 = vpow2.f32 %v1047_v52  ;;  %v1019_v32 = vmul.f32 1.442695, %v981_v27  ;;  %v1021_v40 = vmul.f32 1.442695, %v982_v43  ;;  %v1965_v24 = vpop.eup %1964  ;;  %v2989_v59 = vsel %vm3611_vm13, %v1963_v10, 0.0  ;;  %v3617_v43 = vld [vmem:[#allocation6_spill] sm:$0xff] }
 0x14f   : > { %1978 = vpow2.f32 %v1049_v63  ;;  %v1967_v25 = vpop.eup %1966  ;;  %v1106_v21 = vadd.f32 %v2989_v59, %v2985_v33  ;;  %v2999_v49 = vsel %vm3612_vm8, %v1965_v24, 0.0  ;;  %vm3618_vm1 = vcmp.gt.f32.partialorder %v3617_v43, 0.0 }
 0x150   : > { %1980 = vpow2.f32 %v1019_v32  ;;  %v3003_v28 = vsel %vm3613_vm14, %v1967_v25, 0.0  ;;  %v3619_v32 = vld [vmem:[#allocation7_spill] sm:$0xff] }
 0x151   : > { %v941_v6 = vpop.xlane.xlu1 %940  ;;  %1982 = vpow2.f32 %v1021_v40  ;;  %1107 = vadd.xlane.f32.xlu0 %v1106_v21  ;;  %vm3620_vm13 = vcmp.gt.f32.partialorder %v3619_v32, 0.0 }
 0x152   : > { %v983_v34 = vsub.f32 %v2773_v13, %v941_v6  ;;  %v984_v1 = vsub.f32 %v2780_v36, %v941_v6  ;;  %v962_v14 = vpop.xlane.xlu0 %961  ;;  %v1127_v36 = vadd.f32 %v3003_v28, %v2999_v49 }
 0x153   : > { %v997_v22 = vsub.f32 %v2795_v26, %v962_v14  ;;  %v998_v58 = vsub.f32 %v2799_v62, %v962_v14 }
 0x154   : > { %v1023_v23 = vmul.f32 1.442695, %v983_v34  ;;  %v1025_v13 = vmul.f32 1.442695, %v984_v1  ;;  %v1969_v20 = vpop.eup %1968  ;;  %1128 = vadd.xlane.f32.xlu1 %v1127_v36  ;;  %v1944_v1 = vld [vmem:[%s3553_s6 + $0x68] sm:$0xff]  }
 0x155   : > { %v1051_v56 = vmul.f32 1.442695, %v997_v22  ;;  %v1053_v37 = vmul.f32 1.442695, %v998_v58  ;;  %v1971_v26 = vpop.eup %1970  ;;  %v3009_v62 = vsel %vm3614_vm7, %v1969_v20, 0.0  ;;  %v3621_v58 = vld [vmem:[#allocation8_spill] sm:$0xff]  ;;  %1842 = vmatprep.subr.bf16.mxu0 %v1944_v1  ;;  %1904 = vmatprep.subr.bf16.mxu1 %v1944_v1 }
 0x156   : > { %1984 = vpow2.f32 %v1023_v23  ;;  %v1973_v45 = vpop.eup %1972  ;;  %v3015_v31 = vsel %vm3616_vm4, %v1971_v26, 0.0  ;;  %vm3622_vm8 = vcmp.gt.f32.partialorder %v3621_v58, 0.0  ;;  %vm3628_vm4 = vcmp.gt.f32.partialorder %v3627_v19, 0.0 }
 0x157   : > { %1986 = vpow2.f32 %v1025_v13  ;;  %v1975_v52 = vpop.eup %1974  ;;  %v1109_v27 = vadd.f32 %v3015_v31, %v3009_v62  ;;  %v3021_v2 = vsel %vm3618_vm1, %v1973_v45, 0.0  ;;  %vm3629_vm1 = vcmp.gt.f32.partialorder %v2627_v35, 0.0 }
 0x158   : > { %v965_v29 = vpop.xlane.xlu1 %964  ;;  %1988 = vpow2.f32 %v1051_v56  ;;  %v3027_v40 = vsel %vm3620_vm13, %v1975_v52, 0.0  ;;  %vm3630_vm13 = vcmp.gt.f32.partialorder %v2639_v7, 0.0 }
 0x159   : > { %v999_v46 = vsub.f32 %v2844_v53, %v965_v29  ;;  %v1000_v38 = vsub.f32 %v2848_v4, %v965_v29  ;;  %1990 = vpow2.f32 %v1053_v37  ;;  %1110 = vadd.xlane.f32.xlu1 %v1109_v27  ;;  %v1130_v34 = vadd.f32 %v3027_v40, %v3021_v2  ;;  %v3623_v37 = vld [vmem:[#allocation9_spill] sm:$0xff] }
 0x15a   : > { %vm3624_vm14 = vcmp.gt.f32.partialorder %v3623_v37, 0.0 }
 0x15b   : > { %v944_v63 = vpop.xlane.xlu0 %943  ;;  %v1055_v15 = vmul.f32 1.442695, %v999_v46  ;;  %v1057_v9 = vmul.f32 1.442695, %v1000_v38  ;;  %v1977_v10 = vpop.eup %1976  ;;  %1131 = vadd.xlane.f32.xlu0 %v1130_v34  ;;  %v3625_v38 = vld [vmem:[#allocation10_spill] sm:$0xff] }
 0x15c   : > { %v985_v53 = vsub.f32 %v2861_v51, %v944_v63  ;;  %v986_v4 = vsub.f32 %v2866_v17, %v944_v63  ;;  %v1945_v51 = vld [vmem:[%s3553_s6 + $0x28] sm:$0xff]   ;;  %v1979_v17 = vpop.eup %1978  ;;  %v3041_v23 = vsel %vm3622_vm8, %v1977_v10, 0.0  ;;  %vm3626_vm7 = vcmp.gt.f32.partialorder %v3625_v38, 0.0 }
 0x15d   : > { %1992 = vpow2.f32 %v1055_v15  ;;  %v1981_v13 = vpop.eup %1980  ;;  %v3047_v20 = vsel %vm3624_vm14, %v1979_v17, 0.0  ;;  %1843 = vmatpush3.bf16.msra.mxu0 %v1945_v51  ;;  %1912 = vmatpush3.bf16.msra.mxu1 %v1945_v51  ;;  %vm3631_vm8 = vcmp.gt.f32.partialorder %v2649_v16, 0.0 }
 0x15e   : > { %v1027_v24 = vmul.f32 1.442695, %v985_v53  ;;  %v1029_v6 = vmul.f32 1.442695, %v986_v4  ;;  %v947_v25 = vpop.xlane.xlu1 %946  ;;  %1994 = vpow2.f32 %v1057_v9  ;;  %v1133_v29 = vadd.f32 %v3047_v20, %v3041_v23  ;;  %v1946_v9 = vld [vmem:[%s3553_s6 + $0x60] sm:$0xff]  }
 0x15f   : > { %v987_v14 = vsub.f32 %v2885_v11, %v947_v25  ;;  %v988_v21 = vsub.f32 %v2889_v42, %v947_v25  ;;  %v1983_v11 = vpop.eup %1982  ;;  %v1947_v53 = vld [vmem:[%s3553_s6 + $0x20] sm:$0xff]   ;;  %1844 = vmatprep.subr.bf16.mxu0 %v1946_v9  ;;  %1905 = vmatprep.subr.bf16.mxu1 %v1946_v9  ;;  %v1951_v9 = vld [vmem:[%s3553_s6 + $0x10] sm:$0xff]  }
 0x160   : > { %v968_v22 = vpop.xlane.xlu0 %967  ;;  %1996 = vpow2.f32 %v1027_v24  ;;  %v3057_v52 = vsel %vm3628_vm4, %v1983_v11, 0.0  ;;  %1134 = vadd.xlane.f32.xlu1 %v1133_v29 }
 0x161   : > { %v1001_v36 = vsub.f32 %v2897_v30, %v968_v22  ;;  %v1002_v56 = vsub.f32 %v2901_v50, %v968_v22  ;;  %1998 = vpow2.f32 %v1029_v6  ;;  %v1031_v42 = vmul.f32 1.442695, %v987_v14  ;;  %1845 = vmatpush3.bf16.msra.mxu0 %v1947_v53  ;;  %1913 = vmatpush3.bf16.msra.mxu1 %v1947_v53 }
 0x162   : > { %v1033_v26 = vmul.f32 1.442695, %v988_v21  ;;  %v971_v30 = vpop.xlane.xlu1 %970  ;;  %v3053_v50 = vsel %vm3626_vm7, %v1981_v13, 0.0  ;;  %v3632_v21 = vld [vmem:[#allocation12_spill] sm:$0xff]  ;;  %vm3634_vm7 = vcmp.gt.f32.partialorder %v2695_v57, 0.0 }
 0x163   : > { %v1059_v45 = vmul.f32 1.442695, %v1001_v36  ;;  %v1061_v46 = vmul.f32 1.442695, %v1002_v56  ;;  %2000 = vpow2.f32 %v1031_v42  ;;  %v1003_v63 = vsub.f32 %v2909_v39, %v971_v30  ;;  %v1985_v4 = vpop.eup %1984  ;;  %v3635_v42 = vld [vmem:[#allocation13_spill] sm:$0xff] }
 0x164   : > { %v1004_v27 = vsub.f32 %v2915_v44, %v971_v30  ;;  %v1112_v43 = vadd.f32 %v3057_v52, %v3053_v50  ;;  %2002 = vpow2.f32 %v1033_v26  ;;  %v1987_v10 = vpop.eup %1986  ;;  %v3073_v6 = vsel %vm3629_vm1, %v1985_v4, 0.0  ;;  %v3639_v30 = vld [vmem:[#allocation15_spill] sm:$0xff] }
 0x165   : > { %v950_v15 = vpop.xlane.xlu0 %949  ;;  %2004 = vpow2.f32 %v1059_v45  ;;  %v1063_v32 = vmul.f32 1.442695, %v1003_v63  ;;  %v1989_v25 = vpop.eup %1988  ;;  %v3077_v1 = vsel %vm3630_vm13, %v1987_v10, 0.0  ;;  %vm3633_vm14 = vcmp.gt.f32.partialorder %v3632_v21, 0.0  ;;  %v3637_v45 = vld [vmem:[#allocation14_spill] sm:$0xff]  ;;  %v2055_v21 = vld [vmem:[%s2234_s24 + $0x18] sm:$0xff] }
 0x166   : > { %v1065_v39 = vmul.f32 1.442695, %v1004_v27  ;;  %v989_v44 = vsub.f32 %v2927_v18, %v950_v15  ;;  %1113 = vadd.xlane.f32.xlu0 %v1112_v43  ;;  %2006 = vpow2.f32 %v1061_v46  ;;  %v990_v24 = vsub.f32 %v2931_v5, %v950_v15  ;;  %v1991_v18 = vpop.eup %1990  ;;  %v1950_v15 = vld [vmem:[%s3553_s6 + $0x50] sm:$0xff]  }
 0x167   : > { %2008 = vpow2.f32 %v1063_v32  ;;  %v1115_v35 = vadd.f32 %v3077_v1, %v3073_v6  ;;  %v3083_v5 = vsel %vm3631_vm8, %v1989_v25, 0.0  ;;  %v3089_v22 = vsel %vm3633_vm14, %v1991_v18, 0.0 }
 0x168   : > { %v1035_v34 = vmul.f32 1.442695, %v989_v44  ;;  %2010 = vpow2.f32 %v1065_v39  ;;  %v1037_v51 = vmul.f32 1.442695, %v990_v24  ;;  %v1136_v58 = vadd.f32 %v3089_v22, %v3083_v5 }
 0x169   : > { %v974_v17 = vpop.xlane.xlu0 %973  ;;  %1116 = vadd.xlane.f32.xlu1 %v1115_v35  ;;  %vm3636_vm4 = vcmp.gt.f32.partialorder %v3635_v42, 0.0  ;;  %vm3638_vm1 = vcmp.gt.f32.partialorder %v3637_v45, 0.0  ;;  %vm3640_vm13 = vcmp.gt.f32.partialorder %v3639_v30, 0.0 }
 0x16a   : > { %2012 = vpow2.f32 %v1035_v34  ;;  %v1005_v14 = vsub.f32 %v2939_v47, %v974_v17  ;;  %v1006_v7 = vsub.f32 %v2943_v3, %v974_v17  ;;  %v1993_v13 = vpop.eup %1992  ;;  %1137 = vadd.xlane.f32.xlu0 %v1136_v58  ;;  %v1948_v47 = vld [vmem:[%s3553_s6 + $0x58] sm:$0xff]  }
 0x16b   : > { %2014 = vpow2.f32 %v1037_v51  ;;  %v1995_v16 = vpop.eup %1994  ;;  %v3095_v37 = vsel %vm3634_vm7, %v1993_v13, 0.0  ;;  %v1949_v3 = vld [vmem:[%s3553_s6 + $0x18] sm:$0xff]   ;;  %1846 = vmatprep.subr.bf16.mxu0 %v1948_v47  ;;  %1906 = vmatprep.subr.bf16.mxu1 %v1948_v47  ;;  %v1955_v47 = vld [vmem:[%s3553_s6] sm:$0xff]  }
 0x16c   : > { %v1067_v36 = vmul.f32 1.442695, %v1005_v14  ;;  %v1069_v56 = vmul.f32 1.442695, %v1006_v7  ;;  %v3105_v26 = vsel %vm3636_vm4, %v1995_v16, 0.0  ;;  %1847 = vmatpush3.bf16.msra.mxu0 %v1949_v3  ;;  %1914 = vmatpush3.bf16.msra.mxu1 %v1949_v3  ;;  %v1954_v16 = vld [vmem:[%s3553_s6 + $0x40] sm:$0xff]  }
 0x16d   : > { %v1997_v11 = vpop.eup %1996  ;;  %v1139_v57 = vadd.f32 %v3105_v26, %v3095_v37  ;;  %1848 = vmatprep.subr.bf16.mxu0 %v1950_v15  ;;  %1907 = vmatprep.subr.bf16.mxu1 %v1950_v15 }
 0x16e   : > { %2016 = vpow2.f32 %v1067_v36  ;;  %v1999_v29 = vpop.eup %1998  ;;  %v3111_v46 = vsel %vm3638_vm1, %v1997_v11, 0.0 }
 0x16f   : > { %2018 = vpow2.f32 %v1069_v56  ;;  %v3115_v38 = vsel %vm3640_vm13, %v1999_v29, 0.0  ;;  %1140 = vadd.xlane.f32.xlu1 %v1139_v57 }
 0x170   : > { %v2001_v19 = vpop.eup %2000  ;;  %v1118_v63 = vadd.f32 %v3115_v38, %v3111_v46  ;;  %1849 = vmatpush3.bf16.msra.mxu0 %v1951_v9  ;;  %1915 = vmatpush3.bf16.msra.mxu1 %v1951_v9 }
 0x171   : > { %v2003_v27 = vpop.eup %2002  ;;  %v3121_v43 = vsel %vm445_vm9, %v2001_v19, 0.0  ;;  %1850 = vmatprep.subr.bf16.mxu0 %v1952_v12  ;;  %1908 = vmatprep.subr.bf16.mxu1 %v1952_v12 }
 0x172   : > { %v2005_v53 = vpop.eup %2004  ;;  %1119 = vadd.xlane.f32.xlu0 %v1118_v63  ;;  %v3131_v4 = vsel %vm446_vm11, %v2003_v27, 0.0 }
 0x173   : > { %v2007_v32 = vpop.eup %2006  ;;  %v1121_v48 = vadd.f32 %v3131_v4, %v3121_v43  ;;  %v3137_v39 = vsel %vm459_vm6, %v2005_v53, 0.0 }
 0x174   : > { %v2009_v44 = vpop.eup %2008  ;;  %v3141_v10 = vsel %vm460_vm10, %v2007_v32, 0.0  ;;  %1851 = vmatpush3.bf16.msra.mxu0 %v1953_v0  ;;  %1916 = vmatpush3.bf16.msra.mxu1 %v1953_v0 }
 0x175   : > { %v2011_v41 = vpop.eup %2010  ;;  %1122 = vadd.xlane.f32.xlu1 %v1121_v48  ;;  %v1142_v24 = vadd.f32 %v3141_v10, %v3137_v39  ;;  %v3147_v25 = vsel %vm461_vm5, %v2009_v44, 0.0  ;;  %1852 = vmatprep.subr.bf16.mxu0 %v1954_v16  ;;  %v2052_v44 = vld [vmem:[%s2234_s24] sm:$0xff] }
 0x176   : > { %v3151_v34 = vsel %vm462_vm2, %v2011_v41, 0.0  ;;  %1909 = vmatprep.subr.bf16.mxu1 %v1954_v16 }
 0x177   : > { %v2013_v54 = vpop.eup %2012  ;;  %1143 = vadd.xlane.f32.xlu0 %v1142_v24  ;;  %v1145_v60 = vadd.f32 %v3151_v34, %v3147_v25  ;;  %v2053_v24 = vld [vmem:[%s2234_s24 + $0x8] sm:$0xff] }
 0x178   : > { %v2015_v18 = vpop.eup %2014  ;;  %v3157_v51 = vsel %vm447_vm15, %v2013_v54, 0.0  ;;  %1853 = vmatpush3.bf16.msra.mxu0 %v1955_v47  ;;  %1917 = vmatpush3.bf16.msra.mxu1 %v1955_v47 }
 0x179   : > { %v3161_v35 = vsel %vm448_vm0, %v2015_v18, 0.0  ;;  %1146 = vadd.xlane.f32.xlu1 %v1145_v60 }
 0x17a   : > { %v1124_v14 = vadd.f32 %v3161_v35, %v3157_v51 }
 0x17b   : > { %v2017_v7 = vpop.eup %2016 }
 0x17c   : > { %v2019_v55 = vpop.eup %2018  ;;  %1125 = vadd.xlane.f32.xlu0 %v1124_v14  ;;  %v3173_v58 = vsel %vm463_vm12, %v2017_v7, 0.0  ;;  %v2054_v7 = vld [vmem:[%s2234_s24 + $0x10] sm:$0xff] }
 0x17d   : > { %v3177_v36 = vsel %vm464_vm3, %v2019_v55, 0.0 }
 0x17e   : > { %v1148_v56 = vadd.f32 %v3177_v36, %v3173_v58 }
 0x180   : > { %1149 = vadd.xlane.f32.xlu0 %v1148_v56 }
 0x1d5   : > { %v1105_v3 = vpop.xlane.xlu1 %1104 }
 0x1d6   : > { %v1151_v11 = vmax.f32 %v1105_v3, 1e-30 }
 0x1d8   : > { %2020 = vrcp.f32 %v1151_v11 }
 0x1da   : > { %v1108_v42 = vpop.xlane.xlu0 %1107 }
 0x1db   : > { %v1152_v29 = vmax.f32 %v1108_v42, 1e-30 }
 0x1dd   : > { %v1129_v57 = vpop.xlane.xlu1 %1128  ;;  %2022 = vrcp.f32 %v1152_v29 }
 0x1de   : > { %v1159_v45 = vmax.f32 %v1129_v57, 1e-30 }
 0x1e2   : > { %v1111_v30 = vpop.xlane.xlu1 %1110 }
 0x1e3   : > { %v1153_v19 = vmax.f32 %v1111_v30, 1e-30  ;;  %v2056_v30 = vld [vmem:[%s2234_s24 + $0x20] sm:$0xff] }
 0x1e4   : > { %v1132_v63 = vpop.xlane.xlu0 %1131 }
 0x1e5   : > { %2024 = vrcp.f32 %v1153_v19  ;;  %v1160_v27 = vmax.f32 %v1132_v63, 1e-30  ;;  %v2021_v15 = vpop.eup %2020  ;;  %v2057_v63 = vld [vmem:[%s2234_s24 + $0x28] sm:$0xff] }
 0x1e6   : > { %2026 = vrcp.f32 %v1159_v45  ;;  %v3188_v9 = vmul.f32 %v2021_v15, %v2973_v8  ;;  %v3191_v53 = vmul.f32 %v2021_v15, %v2977_v61 }
 0x1e7   : > { %2028 = vrcp.f32 %v1160_v27 }
 0x1e8   : > { %v1263_v41 = vmul.f32 %v2052_v44, %v3188_v9  ;;  %v1264_v54 = vmul.f32 %v2053_v24, %v3191_v53 }
 0x1e9   : > { %v1135_v32 = vpop.xlane.xlu1 %1134 }
 0x1ea   : > { %v2023_v18 = vpop.eup %2022  ;;  %v1295_v17 = vadd.f32 %v1264_v54, %v1263_v41  ;;  %v1161_v61 = vmax.f32 %v1135_v32, 1e-30 }
 0x1eb   : > { %v3198_v12 = vmul.f32 %v2023_v18, %v2989_v59  ;;  %v3201_v8 = vmul.f32 %v2023_v18, %v2985_v33 }
 0x1ec   : > { %1296 = vadd.xlane.f32.xlu1 %v1295_v17 }
 0x1ed   : > { %v1216_v0 = vpack.c.bf16 %v3198_v12, %v3191_v53  ;;  %v1215_v14 = vpack.c.bf16 %v3201_v8, %v3188_v9  ;;  %v1265_v55 = vmul.f32 %v2054_v7, %v3201_v8  ;;  %v1266_v13 = vmul.f32 %v2055_v21, %v3198_v12  ;;  %v2058_v21 = vld [vmem:[%s2234_s24 + $0x30] sm:$0xff] }
 0x1ef   : > { %v1114_v48 = vpop.xlane.xlu0 %1113  ;;  %1609 = vmatprep.mubr.bf16.mxu0 %v1216_v0  ;;  %v1298_v33 = vadd.f32 %v1266_v13, %v1265_v55 }
 0x1f0   : > { %v1154_v60 = vmax.f32 %v1114_v48, 1e-30  ;;  %1610 = vmatmul.mubr.bf16.vlgmr.msra.gmra.mxu0 %v1215_v14 }
 0x1f1   : > { %1299 = vadd.xlane.f32.xlu0 %v1298_v33 }
 0x1f2   : > { %2030 = vrcp.f32 %v1154_v60  ;;  %v1117_v59 = vpop.xlane.xlu1 %1116  ;;  %v2025_v47 = vpop.eup %2024 }
 0x1f3   : > { %v1155_v56 = vmax.f32 %v1117_v59, 1e-30  ;;  %2032 = vrcp.f32 %v1161_v61  ;;  %v1138_v16 = vpop.xlane.xlu0 %1137  ;;  %v2027_v11 = vpop.eup %2026  ;;  %v3212_v42 = vmul.f32 %v2025_v47, %v3009_v62  ;;  %v3215_v29 = vmul.f32 %v2025_v47, %v3015_v31 }
 0x1f4   : > { %v1162_v3 = vmax.f32 %v1138_v16, 1e-30  ;;  %v2029_v57 = vpop.eup %2028  ;;  %v3222_v15 = vmul.f32 %v2027_v11, %v3003_v28  ;;  %v3228_v62 = vmul.f32 %v2027_v11, %v2999_v49 }
 0x1f5   : > { %2034 = vrcp.f32 %v1155_v56  ;;  %v1267_v19 = vmul.f32 %v2056_v30, %v3212_v42  ;;  %v1268_v27 = vmul.f32 %v2057_v63, %v3215_v29  ;;  %v3225_v32 = vmul.f32 %v2029_v57, %v3027_v40 }
 0x1f6   : > { %2036 = vrcp.f32 %v1162_v3  ;;  %v3231_v31 = vmul.f32 %v2029_v57, %v3021_v2 }
 0x1f7   : > { %v1301_v44 = vadd.f32 %v1268_v27, %v1267_v19  ;;  %v1224_v54 = vpack.c.bf16 %v3225_v32, %v3222_v15 }
 0x1f8   : > { %v1141_v45 = vpop.xlane.xlu1 %1140  ;;  %v1223_v28 = vpack.c.bf16 %v3231_v31, %v3228_v62 }
 0x1f9   : > { %v1163_v41 = vmax.f32 %v1141_v45, 1e-30  ;;  %1302 = vadd.xlane.f32.xlu1 %v1301_v44  ;;  %1641 = vmatprep.mubr.bf16.mxu1 %v1224_v54 }
 0x1fa   : > { %1642 = vmatmul.mubr.bf16.vlgmr.msra.gmra.mxu1 %v1223_v28 }
 0x1fb   : > { %v1120_v48 = vpop.xlane.xlu0 %1119 }
 0x1fc   : > { %v1156_v24 = vmax.f32 %v1120_v48, 1e-30 }
 0x1fe   : > { %2038 = vrcp.f32 %v1156_v24  ;;  %v1123_v40 = vpop.xlane.xlu1 %1122 }
 0x1ff   : > { %v2031_v18 = vpop.eup %2030  ;;  %v1157_v49 = vmax.f32 %v1123_v40, 1e-30  ;;  %2040 = vrcp.f32 %v1163_v41 }
 0x200   : > { %v3238_v2 = vmul.f32 %v2031_v18, %v3057_v52  ;;  %v3241_v60 = vmul.f32 %v2031_v18, %v3053_v50  ;;  %v1144_v17 = vpop.xlane.xlu0 %1143  ;;  %v2033_v7 = vpop.eup %2032  ;;  %v2059_v52 = vld [vmem:[%s2234_s24 + $0x38] sm:$0xff] }
 0x201   : > { %2042 = vrcp.f32 %v1157_v49  ;;  %v1164_v61 = vmax.f32 %v1144_v17, 1e-30  ;;  %v3258_v45 = vmul.f32 %v2033_v7, %v3047_v20  ;;  %v3261_v30 = vmul.f32 %v2033_v7, %v3041_v23  ;;  %v2062_v17 = vld [vmem:[%s2234_s24 + $0x50] sm:$0xff] }
 0x202   : > { %v1218_v0 = vpack.c.bf16 %v3238_v2, %v3215_v29  ;;  %v1217_v14 = vpack.c.bf16 %v3241_v60, %v3212_v42  ;;  %v1147_v55 = vpop.xlane.xlu1 %1146  ;;  %v1269_v13 = vmul.f32 %v2058_v21, %v3241_v60  ;;  %v1270_v59 = vmul.f32 %v2059_v52, %v3238_v2  ;;  %v2035_v50 = vpop.eup %2034 }
 0x203   : > { %2044 = vrcp.f32 %v1164_v61  ;;  %v1165_v56 = vmax.f32 %v1147_v55, 1e-30  ;;  %v3252_v47 = vmul.f32 %v2035_v50, %v3073_v6  ;;  %v3255_v3 = vmul.f32 %v2035_v50, %v3077_v1  ;;  %v2037_v11 = vpop.eup %2036  ;;  %v2060_v6 = vld [vmem:[%s2234_s24 + $0x40] sm:$0xff]  ;;  %v2061_v1 = vld [vmem:[%s2234_s24 + $0x48] sm:$0xff] }
 0x204   : > { %1617 = vmatprep.mubr.bf16.mxu0 %v1218_v0  ;;  %v1304_v16 = vadd.f32 %v1270_v59, %v1269_v13  ;;  %v3264_v19 = vmul.f32 %v2037_v11, %v3089_v22  ;;  %v3267_v63 = vmul.f32 %v2037_v11, %v3083_v5  ;;  %v2063_v0 = vld [vmem:[%s2234_s24 + $0x58] sm:$0xff]  ;;  %v2064_v59 = vld [vmem:[%s2234_s24 + $0x60] sm:$0xff]  ;;  %v2065_v50 = vld [vmem:[%s2234_s24 + $0x68] sm:$0xff] }
 0x205   : > { %v1126_v33 = vpop.xlane.xlu0 %1125  ;;  %1618 = vmatmul.mubr.bf16.gmra.mxu0 %v1217_v14  ;;  %v1271_v27 = vmul.f32 %v2060_v6, %v3252_v47  ;;  %v1272_v48 = vmul.f32 %v2061_v1, %v3255_v3 }
 0x206   : > { %v1158_v57 = vmax.f32 %v1126_v33, 1e-30  ;;  %1305 = vadd.xlane.f32.xlu0 %v1304_v16  ;;  %v1226_v23 = vpack.c.bf16 %v3264_v19, %v3258_v45  ;;  %v1225_v22 = vpack.c.bf16 %v3267_v63, %v3261_v30 }
 0x207   : > { %v1307_v44 = vadd.f32 %v1272_v48, %v1271_v27 }
 0x208   : > { %2046 = vrcp.f32 %v1158_v57  ;;  %1649 = vmatprep.mubr.bf16.mxu1 %v1226_v23 }
 0x209   : > { %2048 = vrcp.f32 %v1165_v56  ;;  %v1150_v20 = vpop.xlane.xlu0 %1149  ;;  %1308 = vadd.xlane.f32.xlu1 %v1307_v44  ;;  %1650 = vmatmul.mubr.bf16.gmra.mxu1 %v1225_v22  ;;  %v2069_v22 = vld [vmem:[%s2234_s24 + $0xa8] sm:$0xff] }
 0x20a   : > { %v1166_v5 = vmax.f32 %v1150_v20, 1e-30  ;;  %v2068_v20 = vld [vmem:[%s2234_s24 + $0xa0] sm:$0xff]  ;;  %v1284_v44 = vmul.f32 %v2069_v22, %v3258_v45  ;;  %v2080_v22 = vld [vmem:[%s2234_s24 + $0xd0] sm:$0xff] }
 0x20b   : > { %v2039_v41 = vpop.eup %2038  ;;  %v1283_v23 = vmul.f32 %v2068_v20, %v3261_v30 }
 0x20c   : > { %2050 = vrcp.f32 %v1166_v5  ;;  %v3278_v24 = vmul.f32 %v2039_v41, %v3115_v38  ;;  %v3281_v54 = vmul.f32 %v2039_v41, %v3111_v46  ;;  %v2041_v28 = vpop.eup %2040  ;;  %v2070_v41 = vld [vmem:[%s2234_s24 + $0x70] sm:$0xff] }
 0x20d   : > { %v3298_v21 = vmul.f32 %v2041_v28, %v3105_v26  ;;  %v3301_v13 = vmul.f32 %v2041_v28, %v3095_v37  ;;  %v2066_v26 = vld [vmem:[%s2234_s24 + $0x80] sm:$0xff]  ;;  %v2067_v37 = vld [vmem:[%s2234_s24 + $0x88] sm:$0xff]  ;;  %v2071_v28 = vld [vmem:[%s2234_s24 + $0x78] sm:$0xff] }
 0x20e   : > { %v2043_v18 = vpop.eup %2042  ;;  %v1220_v40 = vpack.c.bf16 %v3278_v24, %v3255_v3  ;;  %v1219_v49 = vpack.c.bf16 %v3281_v54, %v3252_v47  ;;  %v1273_v61 = vmul.f32 %v2062_v17, %v3281_v54  ;;  %v1274_v38 = vmul.f32 %v2063_v0, %v3278_v24 }
 0x20f   : > { %v3292_v46 = vmul.f32 %v2043_v18, %v3121_v43  ;;  %v3295_v14 = vmul.f32 %v2043_v18, %v3131_v4  ;;  %v1279_v33 = vmul.f32 %v2066_v26, %v3228_v62  ;;  %v1280_v16 = vmul.f32 %v2067_v37, %v3222_v15  ;;  %v2076_v37 = vld [vmem:[%s2234_s24 + $0xb0] sm:$0xff] }
 0x210   : > { %v2045_v7 = vpop.eup %2044  ;;  %1625 = vmatprep.mubr.bf16.mxu0 %v1220_v40  ;;  %v1310_v55 = vadd.f32 %v1274_v38, %v1273_v61  ;;  %v2072_v61 = vld [vmem:[%s2234_s24 + $0x90] sm:$0xff]  ;;  %v2073_v38 = vld [vmem:[%s2234_s24 + $0x98] sm:$0xff] }
 0x211   : > { %1626 = vmatmul.mubr.bf16.gmra.mxu0 %v1219_v49  ;;  %v3304_v52 = vmul.f32 %v2045_v7, %v3141_v10  ;;  %v3307_v43 = vmul.f32 %v2045_v7, %v3137_v39  ;;  %v1275_v4 = vmul.f32 %v2064_v59, %v3292_v46  ;;  %v1276_v56 = vmul.f32 %v2065_v50, %v3295_v14 }
 0x212   : > { %1311 = vadd.xlane.f32.xlu0 %v1310_v55  ;;  %v1319_v48 = vadd.f32 %v1280_v16, %v1279_v33  ;;  %v1281_v0 = vmul.f32 %v2072_v61, %v3231_v31  ;;  %v1282_v7 = vmul.f32 %v2073_v38, %v3225_v32  ;;  %v1285_v16 = vmul.f32 %v2076_v37, %v3267_v63 }
 0x213   : > { %v1228_v10 = vpack.c.bf16 %v3304_v52, %v3298_v21  ;;  %v1227_v39 = vpack.c.bf16 %v3307_v43, %v3301_v13  ;;  %v1313_v11 = vadd.f32 %v1276_v56, %v1275_v4  ;;  %v2074_v56 = vld [vmem:[%s2234_s24 + $0xc0] sm:$0xff] }
 0x214   : > { %v1287_v26 = vmul.f32 %v2074_v56, %v3301_v13 }
 0x215   : > { %v2047_v57 = vpop.eup %2046  ;;  %1657 = vmatprep.mubr.bf16.mxu1 %v1228_v10  ;;  %1314 = vadd.xlane.f32.xlu1 %v1313_v11  ;;  %v2077_v10 = vld [vmem:[%s2234_s24 + $0xb8] sm:$0xff] }
 0x216   : > { %v2049_v6 = vpop.eup %2048  ;;  %v3322_v27 = vmul.f32 %v2047_v57, %v3161_v35  ;;  %v3325_v1 = vmul.f32 %v2047_v57, %v3157_v51  ;;  %1658 = vmatmul.mubr.bf16.gmra.mxu1 %v1227_v39  ;;  %v1286_v39 = vmul.f32 %v2077_v10, %v3264_v19  ;;  %v2078_v57 = vld [vmem:[%s2234_s24 + $0xe0] sm:$0xff]  ;;  %v2091_v10 = vld [vmem:[%s2240_s28 + $0x48] sm:$0xff] }
 0x217   : > { %v3340_v49 = vmul.f32 %v2049_v6, %v3151_v34  ;;  %v3343_v17 = vmul.f32 %v2049_v6, %v3147_v25  ;;  %v1325_v25 = vadd.f32 %v1284_v44, %v1283_v23  ;;  %v1289_v44 = vmul.f32 %v2080_v22, %v3307_v43  ;;  %v2096_v22 = vld [vmem:[%s2240_s28 + $0x50] sm:$0xff] }
 0x218   : > { %v1222_v5 = vpack.c.bf16 %v3322_v27, %v3295_v14  ;;  %v1221_v35 = vpack.c.bf16 %v3325_v1, %v3292_v46  ;;  %v1277_v51 = vmul.f32 %v2070_v41, %v3325_v1  ;;  %v1278_v18 = vmul.f32 %v2071_v28, %v3322_v27 }
 0x219   : > { %v2051_v40 = vpop.eup %2050  ;;  %1320 = vadd.xlane.f32.xlu1 %v1319_v48  ;;  %v1291_v6 = vmul.f32 %v2078_v57, %v3343_v17  ;;  %v2079_v48 = vld [vmem:[%s2234_s24 + $0xe8] sm:$0xff]  ;;  %v1328_v23 = vadd.f32 %v1286_v39, %v1285_v16  ;;  %v2090_v16 = vld [vmem:[%s2240_s28 + $0x40] sm:$0xff]  ;;  %v2093_v57 = vld [vmem:[%s2240_s28 + $0x38] sm:$0xff] }
 0x21a   : > { %1633 = vmatprep.mubr.bf16.mxu0 %v1222_v5  ;;  %v1316_v55 = vadd.f32 %v1278_v18, %v1277_v51  ;;  %v3350_v59 = vmul.f32 %v2051_v40, %v3177_v36  ;;  %v3353_v34 = vmul.f32 %v2051_v40, %v3173_v58  ;;  %v2075_v36 = vld [vmem:[%s2234_s24 + $0xc8] sm:$0xff]  ;;  %v1322_v58 = vadd.f32 %v1282_v7, %v1281_v0  ;;  %v2081_v5 = vld [vmem:[%s2234_s24 + $0xd8] sm:$0xff]  ;;  %v2082_v51 = vld [vmem:[%s2240_s28] sm:$0xff] }
 0x21b   : > { %1634 = vmatmul.mubr.bf16.gmra.mxu0 %v1221_v35  ;;  %v1288_v33 = vmul.f32 %v2075_v36, %v3298_v21  ;;  %v1292_v20 = vmul.f32 %v2079_v48, %v3340_v49  ;;  %v1290_v35 = vmul.f32 %v2081_v5, %v3304_v52  ;;  %v1343_v28 = vmul.f32 %v2082_v51, %v3188_v9  ;;  %v2083_v18 = vld [vmem:[%s2240_s28 + $0x8] sm:$0xff]  ;;  %v2084_v0 = vld [vmem:[%s2234_s24 + $0xf0] sm:$0xff]  ;;  %v2085_v7 = vld [vmem:[%s2234_s24 + $0xf8] sm:$0xff] }
 0x21c   : > { %1317 = vadd.xlane.f32.xlu0 %v1316_v55  ;;  %v1230_v4 = vpack.c.bf16 %v3350_v59, %v3340_v49  ;;  %v1229_v50 = vpack.c.bf16 %v3353_v34, %v3343_v17  ;;  %v1344_v40 = vmul.f32 %v2083_v18, %v3191_v53  ;;  %v1293_v38 = vmul.f32 %v2084_v0, %v3353_v34  ;;  %v2094_v48 = vld [vmem:[%s2240_s28 + $0x60] sm:$0xff]  ;;  %v2101_v18 = vld [vmem:[%s2240_s28 + $0x78] sm:$0xff]  ;;  %v2103_v0 = vld [vmem:[%s2240_s28 + $0xa8] sm:$0xff] }
 0x21d   : > { %1326 = vadd.xlane.f32.xlu1 %v1325_v25  ;;  %v1331_v11 = vadd.f32 %v1288_v33, %v1287_v26  ;;  %v1337_v41 = vadd.f32 %v1292_v20, %v1291_v6  ;;  %v1334_v61 = vadd.f32 %v1290_v35, %v1289_v44  ;;  %v1294_v55 = vmul.f32 %v2085_v7, %v3350_v59  ;;  %v2088_v26 = vld [vmem:[%s2240_s28 + $0x10] sm:$0xff]  ;;  %v2089_v33 = vld [vmem:[%s2240_s28 + $0x18] sm:$0xff]  ;;  %v2095_v20 = vld [vmem:[%s2240_s28 + $0x68] sm:$0xff] }
 0x21e   : > { %1665 = vmatprep.mubr.bf16.mxu1 %v1230_v4  ;;  %v1375_v25 = vadd.f32 %v1344_v40, %v1343_v28  ;;  %v2086_v4 = vld [vmem:[%s2240_s28 + $0x20] sm:$0xff]  ;;  %v1345_v36 = vmul.f32 %v2088_v26, %v3201_v8  ;;  %v2097_v44 = vld [vmem:[%s2240_s28 + $0x58] sm:$0xff]  ;;  %v2100_v28 = vld [vmem:[%s2240_s28 + $0x70] sm:$0xff] }
 0x21f   : > { %1666 = vmatmul.mubr.bf16.gmra.mxu1 %v1229_v50  ;;  %v1347_v9 = vmul.f32 %v2086_v4, %v3212_v42  ;;  %v2087_v50 = vld [vmem:[%s2240_s28 + $0x28] sm:$0xff]  ;;  %v1340_v56 = vadd.f32 %v1294_v55, %v1293_v38  ;;  %v1351_v42 = vmul.f32 %v2090_v16, %v3252_v47  ;;  %v1355_v47 = vmul.f32 %v2094_v48, %v3292_v46  ;;  %v2098_v35 = vld [vmem:[%s2240_s28 + $0x80] sm:$0xff]  ;;  %v2104_v7 = vld [vmem:[%s2240_s28 + $0x90] sm:$0xff] }
 0x220   : > { %1323 = vadd.xlane.f32.xlu0 %v1322_v58  ;;  %v1348_v53 = vmul.f32 %v2087_v50, %v3215_v29  ;;  %v1346_v58 = vmul.f32 %v2089_v33, %v3198_v12  ;;  %v1352_v29 = vmul.f32 %v2091_v10, %v3255_v3  ;;  %v1350_v12 = vmul.f32 %v2093_v57, %v3238_v2  ;;  %v2105_v55 = vld [vmem:[%s2240_s28 + $0x98] sm:$0xff]  ;;  %v2106_v4 = vld [vmem:[%s2240_s28 + $0xc0] sm:$0xff]  ;;  %v2111_v33 = vld [vmem:[%s2240_s28 + $0xe8] sm:$0xff] }
 0x221   : > { %1332 = vadd.xlane.f32.xlu1 %v1331_v11  ;;  %v2092_v11 = vld [vmem:[%s2240_s28 + $0x30] sm:$0xff]  ;;  %v1356_v3 = vmul.f32 %v2095_v20, %v3295_v14  ;;  %v1354_v2 = vmul.f32 %v2097_v44, %v3278_v24  ;;  %v1359_v46 = vmul.f32 %v2098_v35, %v3228_v62  ;;  %v1358_v24 = vmul.f32 %v2101_v18, %v3322_v27  ;;  %v3464_v44 = vld [vmem:[%s3554_s7 + $0x1] ss:$0 sm:$0xff] }
 0x222   : > { %v1381_v37 = vadd.f32 %v1348_v53, %v1347_v9  ;;  %v1378_v39 = vadd.f32 %v1346_v58, %v1345_v36  ;;  %v1349_v8 = vmul.f32 %v2092_v11, %v3241_v60  ;;  %v1387_v6 = vadd.f32 %v1352_v29, %v1351_v42  ;;  %v2107_v9 = vld [vmem:[%s2240_s28 + $0xc8] sm:$0xff]  ;;  %v2108_v53 = vld [vmem:[%s2240_s28 + $0xb0] sm:$0xff]  ;;  %v2110_v36 = vld [vmem:[%s2240_s28 + $0xe0] sm:$0xff] }
 0x223   : > { %v1353_v60 = vmul.f32 %v2096_v22, %v3281_v54  ;;  %v1393_v5 = vadd.f32 %v1356_v3, %v1355_v47  ;;  %v1357_v54 = vmul.f32 %v2100_v28, %v3325_v1  ;;  %v1361_v1 = vmul.f32 %v2104_v7, %v3231_v31  ;;  %v2113_v42 = vld [vmem:[%s2240_s28 + $0xd8] sm:$0xff]  ;;  %v2114_v29 = vld [vmem:[%s2240_s28 + $0xf0] sm:$0xff] }
 0x224   : > { %1329 = vadd.xlane.f32.xlu0 %v1328_v23  ;;  %v1384_v23 = vadd.f32 %v1350_v12, %v1349_v8  ;;  %v1362_v27 = vmul.f32 %v2105_v55, %v3225_v32  ;;  %v1365_v31 = vmul.f32 %v2108_v53, %v3267_v63  ;;  %v1372_v58 = vmul.f32 %v2111_v33, %v3340_v49  ;;  %v2115_v11 = vld [vmem:[%s2240_s28 + $0xf8] sm:$0xff] }
 0x225   : > { %1338 = vadd.xlane.f32.xlu1 %v1337_v41  ;;  %v2099_v41 = vld [vmem:[%s2240_s28 + $0x88] sm:$0xff]  ;;  %v1390_v51 = vadd.f32 %v1354_v2, %v1353_v60  ;;  %v1396_v38 = vadd.f32 %v1358_v24, %v1357_v54  ;;  %v1370_v63 = vmul.f32 %v2113_v42, %v3304_v52 }
 0x226   : > { %v1360_v14 = vmul.f32 %v2099_v41, %v3222_v15  ;;  %v1364_v15 = vmul.f32 %v2103_v0, %v3258_v45  ;;  %v1368_v45 = vmul.f32 %v2107_v9, %v3298_v21  ;;  %v1402_v50 = vadd.f32 %v1362_v27, %v1361_v1 }
 0x228   : > { %1335 = vadd.xlane.f32.xlu0 %v1334_v61  ;;  %v1399_v40 = vadd.f32 %v1360_v14, %v1359_v46  ;;  %v2102_v61 = vld [vmem:[%s2240_s28 + $0xa0] sm:$0xff] }
 0x229   : > { %1376 = vadd.xlane.f32.xlu1 %v1375_v25  ;;  %v1363_v62 = vmul.f32 %v2102_v61, %v3261_v30  ;;  %v1367_v30 = vmul.f32 %v2106_v4, %v3301_v13  ;;  %v1371_v13 = vmul.f32 %v2110_v36, %v3343_v17  ;;  %v1374_v17 = vmul.f32 %v2115_v11, %v3350_v59 }
 0x22b   : > { %v1405_v25 = vadd.f32 %v1364_v15, %v1363_v62  ;;  %v1411_v32 = vadd.f32 %v1368_v45, %v1367_v30 }
 0x22c   : > { %1341 = vadd.xlane.f32.xlu0 %v1340_v56  ;;  %v2109_v56 = vld [vmem:[%s2240_s28 + $0xb8] sm:$0xff] }
 0x22d   : > { %1382 = vadd.xlane.f32.xlu1 %v1381_v37  ;;  %v1366_v26 = vmul.f32 %v2109_v56, %v3264_v19  ;;  %v2112_v37 = vld [vmem:[%s2240_s28 + $0xd0] sm:$0xff]  ;;  %v1417_v19 = vadd.f32 %v1372_v58, %v1371_v13 }
 0x22e   : > { %v1369_v16 = vmul.f32 %v2112_v37, %v3307_v43 }
 0x22f   : > { %v1408_v21 = vadd.f32 %v1366_v26, %v1365_v31 }
 0x230   : > { %1379 = vadd.xlane.f32.xlu0 %v1378_v39  ;;  %v1414_v10 = vadd.f32 %v1370_v63, %v1369_v16  ;;  %v1373_v39 = vmul.f32 %v2114_v29, %v3353_v34 }
 0x231   : > { %1388 = vadd.xlane.f32.xlu1 %v1387_v6 }
 0x232   : > { %v1420_v49 = vadd.f32 %v1374_v17, %v1373_v39 }
 0x234   : > { %1385 = vadd.xlane.f32.xlu0 %v1384_v23 }
 0x235   : > { %1394 = vadd.xlane.f32.xlu1 %v1393_v5  ;;  %v3469_v5 = vld [vmem:[%s3554_s7] ss:$0 sm:$0xff] }
 0x238   : > { %1391 = vadd.xlane.f32.xlu0 %v1390_v51 }
 0x239   : > { %1400 = vadd.xlane.f32.xlu1 %v1399_v40 }
 0x23c   : > { %1397 = vadd.xlane.f32.xlu0 %v1396_v38 }
 0x23d   : > { %1406 = vadd.xlane.f32.xlu1 %v1405_v25 }
 0x240   : > { %1403 = vadd.xlane.f32.xlu0 %v1402_v50 }
 0x241   : > { %1412 = vadd.xlane.f32.xlu1 %v1411_v32 }
 0x244   : > { %1409 = vadd.xlane.f32.xlu0 %v1408_v21 }
 0x245   : > { %1418 = vadd.xlane.f32.xlu1 %v1417_v19 }
 0x248   : > { %1415 = vadd.xlane.f32.xlu0 %v1414_v10 }
 0x24c   : > { %1421 = vadd.xlane.f32.xlu0 %v1420_v49 }
 0x275   : > { %v1297_v8 = vpop.xlane.xlu1 %1296 }
 0x276   : > { %v1428_v14 = vmul.f32 %v3469_v5, %v1297_v8 }
 0x27a   : > { %v1300_v12 = vpop.xlane.xlu0 %1299 }
 0x27b   : > { %v1429_v62 = vmul.f32 %v3469_v5, %v1300_v12 }
 0x282   : > { %v1303_v57 = vpop.xlane.xlu1 %1302 }
 0x283   : > { %v1430_v13 = vmul.f32 %v3469_v5, %v1303_v57 }
 0x28f   : > { %v1306_v6 = vpop.xlane.xlu0 %1305 }
 0x290   : > { %v1431_v10 = vmul.f32 %v3469_v5, %v1306_v6 }
 0x292   : > { %v3443_v43 = vpop.xlane.xlu1 %1308 }
 0x29b   : > { %v3447_v48 = vpop.xlane.xlu0 %1311 }
 0x29e   : > { %v3445_v52 = vpop.xlane.xlu1 %1314 }
 0x2a2   : > { %v1321_v47 = vpop.xlane.xlu1 %1320 }
 0x2a3   : > { %v1436_v50 = vmul.f32 %v3469_v5, %v1321_v47 }
 0x2a5   : > { %v3449_v20 = vpop.xlane.xlu0 %1317 }
 0x2a6   : > { %v3451_v34 = vpop.xlane.xlu1 %1326 }
 0x2a7   : > { %v1438_v6 = vmul.f32 %v3469_v5, %v3451_v34 }
 0x2a9   : > { %v1324_v3 = vpop.xlane.xlu0 %1323 }
 0x2aa   : > { %v3453_v59 = vpop.xlane.xlu1 %1332  ;;  %v1437_v11 = vmul.f32 %v3469_v5, %v1324_v3 }
 0x2ad   : > { %v3455_v23 = vpop.xlane.xlu0 %1329 }
 0x2ae   : > { %v3457_v22 = vpop.xlane.xlu1 %1338 }
 0x2b0   : > { %v1854_v41 = vpop.f32.mrf.mxu0 }
 0x2b1   : > { %v3459_v60 = vpop.xlane.xlu0 %1335 }
 0x2b2   : > { %v1377_v2 = vpop.xlane.xlu1 %1376  ;;  %v1855_v28 = vpop.f32.mrf.mxu0 }
 0x2b3   : > { %v1449_v35 = vmul.f32 %v3464_v44, %v1377_v2  ;;  %v1856_v24 = vadd.f32 %v1855_v28, %v1854_v41 }
 0x2b4   : > { %v1857_v61 = vpop.f32.mrf.mxu0 }
 0x2b5   : > { %v3472_v46 = vpop.xlane.xlu0 %1341  ;;  %v1465_v54 = vadd.f32 %v1449_v35, %v1428_v14 }
 0x2b6   : > { %v1383_v51 = vpop.xlane.xlu1 %1382  ;;  %v1858_v38 = vpop.f32.mrf.mxu0 }
 0x2b7   : > { %v1612_v15 = vadd.f32 %v1856_v24, %v1465_v54  ;;  %v1859_v55 = vadd.f32 %v1858_v38, %v1857_v61  ;;  %v1451_v53 = vmul.f32 %v3464_v44, %v1383_v51  ;;  %v1439_v61 = vmul.f32 %v3469_v5, %v3455_v23 }
 0x2b9   : > { %v1380_v18 = vpop.xlane.xlu0 %1379  ;;  %1674 = vst [vmem:[%s3480_s16] sm:$0xff] %v1612_v15  ;;  %v1467_v37 = vadd.f32 %v1451_v53, %v1430_v13 }
 0x2ba   : > { %v1450_v40 = vmul.f32 %v3464_v44, %v1380_v18  ;;  %v1389_v0 = vpop.xlane.xlu1 %1388  ;;  %v1878_v4 = vpop.f32.mrf.mxu1 }
 0x2bc   : > { %v1466_v7 = vadd.f32 %v1450_v40, %v1429_v62  ;;  %v1879_v9 = vpop.f32.mrf.mxu1  ;;  %v1453_v62 = vmul.f32 %v3464_v44, %v1389_v0 }
 0x2bd   : > { %v1386_v1 = vpop.xlane.xlu0 %1385  ;;  %v1880_v56 = vadd.f32 %v1879_v9, %v1878_v4 }
 0x2be   : > { %v3485_v27 = vpop.xlane.xlu1 %1394  ;;  %v1615_v25 = vadd.f32 %v1859_v55, %v1466_v7  ;;  %v1881_v26 = vpop.f32.mrf.mxu1  ;;  %v1452_v16 = vmul.f32 %v3464_v44, %v1386_v1  ;;  %v1432_v7 = vmul.f32 %v3469_v5, %v3443_v43 }
 0x2c0   : > { %1675 = vst [vmem:[%s3480_s16 + $0x8] sm:$0xff] %v1615_v25  ;;  %v1882_v21 = vpop.f32.mrf.mxu1  ;;  %v1468_v47 = vadd.f32 %v1452_v16, %v1431_v10  ;;  %v1469_v9 = vadd.f32 %v1453_v62, %v1432_v7 }
 0x2c1   : > { %v1392_v30 = vpop.xlane.xlu0 %1391  ;;  %v1883_v8 = vadd.f32 %v1882_v21, %v1881_v26 }
 0x2c2   : > { %v1401_v45 = vpop.xlane.xlu1 %1400 }
 0x2c3   : > { %v1457_v31 = vmul.f32 %v3464_v44, %v1401_v45  ;;  %v1454_v45 = vmul.f32 %v3464_v44, %v1392_v30 }
 0x2c5   : > { %v3491_v32 = vpop.xlane.xlu0 %1397  ;;  %v1860_v36 = vpop.f32.mrf.mxu0  ;;  %v1473_v33 = vadd.f32 %v1457_v31, %v1436_v50  ;;  %v1433_v31 = vmul.f32 %v3469_v5, %v3447_v48 }
 0x2c6   : > { %v1407_v42 = vpop.xlane.xlu1 %1406 }
 0x2c7   : > { %v1861_v58 = vpop.f32.mrf.mxu0  ;;  %v1644_v63 = vadd.f32 %v1880_v56, %v1473_v33  ;;  %v1459_v57 = vmul.f32 %v3464_v44, %v1407_v42  ;;  %v1455_v33 = vmul.f32 %v3464_v44, %v3485_v27  ;;  %v1470_v30 = vadd.f32 %v1454_v45, %v1433_v31 }
 0x2c8   : > { %v1862_v19 = vadd.f32 %v1861_v58, %v1860_v36  ;;  %v1440_v36 = vmul.f32 %v3469_v5, %v3453_v59  ;;  %v1441_v27 = vmul.f32 %v3469_v5, %v3459_v60  ;;  %v1435_v60 = vmul.f32 %v3469_v5, %v3449_v20 }
 0x2c9   : > { %v1404_v29 = vpop.xlane.xlu0 %1403  ;;  %v1863_v39 = vpop.f32.mrf.mxu0  ;;  %1682 = vst [vmem:[%s3480_s16 + $0x40] sm:$0xff] %v1644_v63  ;;  %v1475_v54 = vadd.f32 %v1459_v57, %v1438_v6  ;;  %v1434_v63 = vmul.f32 %v3469_v5, %v3445_v52 }
 0x2ca   : > { %v1458_v17 = vmul.f32 %v3464_v44, %v1404_v29  ;;  %v1620_v49 = vadd.f32 %v1862_v19, %v1467_v37  ;;  %v1884_v35 = vpop.f32.mrf.mxu1  ;;  %v1413_v1 = vpop.xlane.xlu1 %1412 }
 0x2cb   : > { %v1864_v12 = vpop.f32.mrf.mxu0  ;;  %v1461_v0 = vmul.f32 %v3464_v44, %v1413_v1 }
 0x2cc   : > { %v1474_v2 = vadd.f32 %v1458_v17, %v1437_v11  ;;  %1676 = vst [vmem:[%s3480_s16 + $0x10] sm:$0xff] %v1620_v49  ;;  %v1865_v41 = vadd.f32 %v1864_v12, %v1863_v39  ;;  %v1885_v28 = vpop.f32.mrf.mxu1  ;;  %v1471_v39 = vadd.f32 %v1455_v33, %v1434_v63  ;;  %v1456_v11 = vmul.f32 %v3464_v44, %v3491_v32 }
 0x2cd   : > { %v1410_v14 = vpop.xlane.xlu0 %1409  ;;  %v1886_v24 = vadd.f32 %v1885_v28, %v1884_v35  ;;  %v1477_v37 = vadd.f32 %v1461_v0, %v1440_v36  ;;  %v1442_v32 = vmul.f32 %v3469_v5, %v3457_v22 }
 0x2ce   : > { %v1647_v3 = vadd.f32 %v1883_v8, %v1474_v2  ;;  %v1623_v51 = vadd.f32 %v1865_v41, %v1468_v47  ;;  %v1460_v18 = vmul.f32 %v3464_v44, %v1410_v14  ;;  %v1887_v40 = vpop.f32.mrf.mxu1  ;;  %v1419_v16 = vpop.xlane.xlu1 %1418  ;;  %v1472_v14 = vadd.f32 %v1456_v11, %v1435_v60 }
 0x2cf   : > { %v1652_v15 = vadd.f32 %v1886_v24, %v1475_v54  ;;  %v1463_v8 = vmul.f32 %v3464_v44, %v1419_v16 }
 0x2d0   : > { %1683 = vst [vmem:[%s3480_s16 + $0x48] sm:$0xff] %v1647_v3  ;;  %1677 = vst [vmem:[%s3480_s16 + $0x18] sm:$0xff] %v1623_v51  ;;  %v1888_v34 = vpop.f32.mrf.mxu1  ;;  %v1476_v55 = vadd.f32 %v1460_v18, %v1439_v61 }
 0x2d1   : > { %v1866_v38 = vpop.f32.mrf.mxu0  ;;  %1684 = vst [vmem:[%s3480_s16 + $0x50] sm:$0xff] %v1652_v15  ;;  %v1889_v25 = vadd.f32 %v1888_v34, %v1887_v40  ;;  %v1416_v56 = vpop.xlane.xlu0 %1415  ;;  %v1479_v28 = vadd.f32 %v1463_v8, %v1442_v32  ;;  %v1443_v40 = vmul.f32 %v3469_v5, %v3472_v46 }
 0x2d2   : > { %v1462_v48 = vmul.f32 %v3464_v44, %v1416_v56 }
 0x2d3   : > { %v1867_v4 = vpop.f32.mrf.mxu0  ;;  %v1655_v23 = vadd.f32 %v1889_v25, %v1476_v55 }
 0x2d4   : > { %v1868_v50 = vadd.f32 %v1867_v4, %v1866_v38  ;;  %v1478_v57 = vadd.f32 %v1462_v48, %v1441_v27 }
 0x2d5   : > { %v1869_v53 = vpop.f32.mrf.mxu0  ;;  %1685 = vst [vmem:[%s3480_s16 + $0x58] sm:$0xff] %v1655_v23  ;;  %v1422_v12 = vpop.xlane.xlu0 %1421 }
 0x2d6   : > { %v1628_v26 = vadd.f32 %v1868_v50, %v1469_v9  ;;  %v1890_v43 = vpop.f32.mrf.mxu1  ;;  %v1464_v54 = vmul.f32 %v3464_v44, %v1422_v12 }
 0x2d7   : > { %v1870_v13 = vpop.f32.mrf.mxu0 }
 0x2d8   : > { %1678 = vst [vmem:[%s3480_s16 + $0x20] sm:$0xff] %v1628_v26  ;;  %v1871_v58 = vadd.f32 %v1870_v13, %v1869_v53  ;;  %v1891_v21 = vpop.f32.mrf.mxu1  ;;  %v1480_v15 = vadd.f32 %v1464_v54, %v1443_v40 }
 0x2d9   : > { %v1892_v42 = vadd.f32 %v1891_v21, %v1890_v43 }
 0x2da   : > { %v1631_v19 = vadd.f32 %v1871_v58, %v1470_v30  ;;  %v1893_v10 = vpop.f32.mrf.mxu1 }
 0x2db   : > { %v1872_v59 = vpop.f32.mrf.mxu0  ;;  %v1660_v29 = vadd.f32 %v1892_v42, %v1477_v37 }
 0x2dc   : > { %1679 = vst [vmem:[%s3480_s16 + $0x28] sm:$0xff] %v1631_v19  ;;  %v1894_v49 = vpop.f32.mrf.mxu1 }
 0x2dd   : > { %v1873_v17 = vpop.f32.mrf.mxu0  ;;  %1686 = vst [vmem:[%s3480_s16 + $0x60] sm:$0xff] %v1660_v29  ;;  %v1895_v47 = vadd.f32 %v1894_v49, %v1893_v10 }
 0x2de   : > { %v1874_v52 = vadd.f32 %v1873_v17, %v1872_v59 }
 0x2df   : > { %v1875_v2 = vpop.f32.mrf.mxu0  ;;  %v1896_v35 = vpop.f32.mrf.mxu1  ;;  %v1663_v6 = vadd.f32 %v1895_v47, %v1478_v57 }
 0x2e0   : > { %v1636_v41 = vadd.f32 %v1874_v52, %v1471_v39 }
 0x2e1   : > { %v1876_v3 = vpop.f32.mrf.mxu0  ;;  %v1897_v51 = vpop.f32.mrf.mxu1  ;;  %1687 = vst [vmem:[%s3480_s16 + $0x68] sm:$0xff] %v1663_v6 }
 0x2e2   : > { %1680 = vst [vmem:[%s3480_s16 + $0x30] sm:$0xff] %v1636_v41  ;;  %v1877_v18 = vadd.f32 %v1876_v3, %v1875_v2  ;;  %v1898_v20 = vadd.f32 %v1897_v51, %v1896_v35 }
 0x2e3   : > { %v1899_v24 = vpop.f32.mrf.mxu1 }
 0x2e4   : > { %v1639_v22 = vadd.f32 %v1877_v18, %v1472_v14  ;;  %v1668_v61 = vadd.f32 %v1898_v20, %v1479_v28 }
 0x2e5   : > { %v1900_v62 = vpop.f32.mrf.mxu1 }
 0x2e6   : > { %1681 = vst [vmem:[%s3480_s16 + $0x38] sm:$0xff] %v1639_v22  ;;  %1688 = vst [vmem:[%s3480_s16 + $0x70] sm:$0xff] %v1668_v61  ;;  %v1901_v38 = vadd.f32 %v1900_v62, %v1899_v24 }
 0x2e8   : > { %v1671_v34 = vadd.f32 %v1901_v38, %v1480_v15 }
 0x2ea   : > { %1689 = vst [vmem:[%s3480_s16 + $0x78] sm:$0xff] %v1671_v34 }
 0x2eb PF: > { %s19_s27 = sadd.s32 1, %s2141_s27  }
 0x2ec   : > { %p16_p1 = scmp.ge.s32.totalorder %s19_s27, 4  }
 0x2ee   :  { %18 = sbr.rel (!%p16_p1) target bundleno = 1 (0x1), region = 96 }
 0x2f3   :  { %1712 = vsyncpa [#allocation3], 1 }
 0x2f4   :  { %1714 = vsyncpa [#allocation3 + $0x1], 1 }

</bundles_post_ra>
